<compile_context>
chip_gen: v7x
topology: tpu7x:2x2x1
jax: 0.10.0
libtpu: 0.0.40
codegen_flags: <defaults>
</compile_context>

<pallas_src>
import functools

import jax
import jax.numpy as jnp
from jax.experimental import pallas as pl
from jax.experimental.pallas import tpu as pltpu


def _round_up(a: int, b: int) -> int:
    return (a + b - 1) // b * b


def _cdiv(a: int, b: int) -> int:
    return -(-a // b)


def _vmem_budget_bytes() -> int:
    """~80% of physical per-core VMEM (headroom for Mosaic internal scratch)."""
    cap = None
    try:
        info = pltpu.get_tpu_info()
        cap = getattr(info, "vmem_capacity_bytes", None)
    except Exception:
        cap = None
    if not cap:
        cap = 64 * 1024 * 1024  # conservative fallback (v7x physical per-core)
    return int(cap * 0.8)


# ----------------------------------------------------------------------------
# Kernels
# ----------------------------------------------------------------------------
def _ffn_ln_fused_kernel(x_ref, w1_ref, b1_ref, w2_ref, b2_ref, g_ref, beta_ref,
                         o_ref, *, eps: float, inv_c: float):
    """Fast path: full hidden dim resident. grid = (token_tiles,)."""
    x = x_ref[...]
    hid = jnp.dot(x, w1_ref[...], preferred_element_type=jnp.float32)
    hid = jnp.maximum(hid + b1_ref[...].astype(jnp.float32), 0.0)
    ffn = jnp.dot(hid.astype(w2_ref.dtype), w2_ref[...],
                  preferred_element_type=jnp.float32)
    y = x.astype(jnp.float32) + ffn + b2_ref[...].astype(jnp.float32)
    # Single-pass LayerNorm statistics: var = E[y^2] - mean^2.
    mean = jnp.sum(y, axis=-1, keepdims=True) * inv_c
    ex2 = jnp.sum(y * y, axis=-1, keepdims=True) * inv_c
    inv = jax.lax.rsqrt(ex2 - mean * mean + eps)
    out = (y - mean) * inv * g_ref[...].astype(jnp.float32) \
          + beta_ref[...].astype(jnp.float32)
    o_ref[...] = out.astype(o_ref.dtype)


def _ffn_ln_chunked_kernel(x_ref, w1_ref, b1_ref, w2_ref, b2_ref, g_ref,
                           beta_ref, o_ref, acc_ref, *, eps: float,
                           inv_c: float):
    """Chunked path: grid = (token_tiles, hidden_chunks); hidden is a reduction."""
    h_idx = pl.program_id(1)

    @pl.when(h_idx == 0)
    def _():
        acc_ref[...] = jnp.zeros_like(acc_ref)

    hid = jnp.dot(x_ref[...], w1_ref[...],
                  preferred_element_type=jnp.float32)              # (TM, TH)
    hid = jnp.maximum(hid + b1_ref[...].astype(jnp.float32), 0.0)
    acc_ref[...] += jnp.dot(hid.astype(w2_ref.dtype), w2_ref[...],
                            preferred_element_type=jnp.float32)     # (TM, C)

    @pl.when(h_idx == pl.num_programs(1) - 1)
    def _():
        y = x_ref[...].astype(jnp.float32) + acc_ref[...] \
            + b2_ref[...].astype(jnp.float32)
        mean = jnp.sum(y, axis=-1, keepdims=True) * inv_c
        ex2 = jnp.sum(y * y, axis=-1, keepdims=True) * inv_c
        inv = jax.lax.rsqrt(ex2 - mean * mean + eps)
        out = (y - mean) * inv * g_ref[...].astype(jnp.float32) \
              + beta_ref[...].astype(jnp.float32)
        o_ref[...] = out.astype(o_ref.dtype)


# ----------------------------------------------------------------------------
# Tile planning
# ----------------------------------------------------------------------------
def _plan_fast(N, C, H, itemsize, budget, desired_tm):
    """Token tile for the resident-weight path, or None if weights don't fit."""
    param_bytes = 2 * (2 * C * H + H + 3 * C) * itemsize   # dbl-buffered params

    def need(tm):
        io = 4 * tm * C * itemsize            # x + out, double-buffered
        tmp = 4 * tm * H + 8 * tm * C         # hid (f32) + y/out (f32) temps
        return param_bytes + io + tmp

    tm = max(8, min(_round_up(desired_tm, 8), _round_up(N, 8)))
    while tm > 8 and need(tm) > budget:
        tm = max(8, _round_up(tm // 2, 8))
    if need(tm) > budget:
        return None
    return tm


def _plan_chunked(N, C, H, itemsize, budget, desired_tm, desired_th):
    """(tile_m, tile_h) for the accumulator path."""
    th = min(desired_th, H)
    if th < H:
        th = max(128, th // 128 * 128)
        for cand in range(th, 127, -128):     # prefer a divisor of H: no pad
            if H % cand == 0:
                th = cand
                break
    th = min(th, H)

    param_bytes = 2 * (2 * C * th + th + 3 * C) * itemsize
    per_row = 4 * C * itemsize + 4 * C + 4 * th + 4 * C  # io + acc + hid + y
    avail = budget - param_bytes
    tm_cap = max(8, avail // per_row) if avail > 0 else 8
    tm = min(desired_tm, tm_cap, _round_up(N, 8))
    if tm >= 256:
        tm = tm // 256 * 256
    elif tm >= 128:
        tm = tm // 128 * 128
    else:
        tm = max(8, tm // 8 * 8)
    return int(tm), int(th)


# ----------------------------------------------------------------------------
# Wrapper
# ----------------------------------------------------------------------------
def feed_forward_layer(x, w1, b1, w2, b2, gamma, beta, *, eps=1e-5,
                       tile_m=None, tile_h=None):
    """x: (B, S, C). Returns LayerNorm(x + Linear2(ReLU(Linear1(x)))).

    Weights are stored transposed vs. torch: w1 (C, H), w2 (H, C);
    biases / gamma / beta are (1, H) / (1, C).
    """
    B, S, C = x.shape
    H = w1.shape[1]
    N = B * S
    itemsize = x.dtype.itemsize

    vmem_limit = _vmem_budget_bytes()
    plan_budget = int(vmem_limit * 0.9)

    x2d = x.reshape(N, C)
    inv_c = 1.0 / C

    # TODO(synk): best MXU / store density needs C to be a multiple of 128
    # (256 preferred on v6e/v7x); kernel is correct for any C but the caller
    # should choose lane-dense channel counts.

    use_fast = (tile_h is None) or (tile_h >= H)
    tm = None
    if use_fast:
        tm = _plan_fast(N, C, H, itemsize, plan_budget, tile_m or 512)
        use_fast = tm is not None

    if use_fast:
        # v7x megacore: ensure the "parallel" token axis has >= 2 tiles so both
        # TensorCores get work (free here: weights are DMA'd only once).
        if _cdiv(N, tm) == 1 and N > 8:
            tm = max(8, _round_up(_cdiv(N, 2), 8))
        n_tiles = _cdiv(N, tm)
        cost = pl.CostEstimate(
            flops=int(4 * N * C * H),
            transcendentals=int(N),
            bytes_accessed=int(2 * N * C * itemsize
                               + (2 * C * H + H + 3 * C) * itemsize))
        out2d = pl.pallas_call(
            functools.partial(_ffn_ln_fused_kernel, eps=eps, inv_c=inv_c),
            out_shape=jax.ShapeDtypeStruct((N, C), x.dtype),
            grid_spec=pltpu.PrefetchScalarGridSpec(
                num_scalar_prefetch=0,
                grid=(n_tiles,),
                in_specs=[
                    pl.BlockSpec((tm, C), lambda i: (i, 0)),   # x tile
                    pl.BlockSpec((C, H), lambda i: (0, 0)),    # W1 (resident)
                    pl.BlockSpec((1, H), lambda i: (0, 0)),    # b1
                    pl.BlockSpec((H, C), lambda i: (0, 0)),    # W2 (resident)
                    pl.BlockSpec((1, C), lambda i: (0, 0)),    # b2
                    pl.BlockSpec((1, C), lambda i: (0, 0)),    # gamma
                    pl.BlockSpec((1, C), lambda i: (0, 0)),    # beta
                ],
                out_specs=pl.BlockSpec((tm, C), lambda i: (i, 0)),
            ),
            compiler_params=pltpu.CompilerParams(
                dimension_semantics=("parallel",),
                vmem_limit_bytes=vmem_limit),
            cost_estimate=cost,
        )(x2d, w1, b1, w2, b2, gamma, beta)
        return out2d.reshape(B, S, C)

    # ---- chunked-hidden path (large C*H): resident (TM, C) f32 accumulator --
    tm, th = _plan_chunked(N, C, H, itemsize, plan_budget,
                           tile_m or 1024, tile_h or 512)
    h_pad = _round_up(H, th)
    w1p, b1p, w2p = w1, b1, w2
    if h_pad != H:
        # TODO(synk): pre-pad weights once at parameter-init time to avoid this
        # per-call HBM copy (zero-padded hidden units contribute exactly 0).
        w1p = jnp.pad(w1, ((0, 0), (0, h_pad - H)))
        b1p = jnp.pad(b1, ((0, 0), (0, h_pad - H)))
        w2p = jnp.pad(w2, ((0, h_pad - H), (0, 0)))

    n_tok = _cdiv(N, tm)
    n_h = h_pad // th
    cost = pl.CostEstimate(
        flops=int(4 * N * C * H),
        transcendentals=int(N),
        bytes_accessed=int(2 * N * C * itemsize
                           + n_tok * (2 * C * h_pad + h_pad + 3 * C) * itemsize))
    out2d = pl.pallas_call(
        functools.partial(_ffn_ln_chunked_kernel, eps=eps, inv_c=inv_c),
        out_shape=jax.ShapeDtypeStruct((N, C), x.dtype),
        grid_spec=pltpu.PrefetchScalarGridSpec(
            num_scalar_prefetch=0,
            grid=(n_tok, n_h),
            in_specs=[
                pl.BlockSpec((tm, C), lambda i, h: (i, 0)),    # x tile
                pl.BlockSpec((C, th), lambda i, h: (0, h)),    # W1 chunk
                pl.BlockSpec((1, th), lambda i, h: (0, h)),    # b1 chunk
                pl.BlockSpec((th, C), lambda i, h: (h, 0)),    # W2 chunk
                pl.BlockSpec((1, C), lambda i, h: (0, 0)),     # b2
                pl.BlockSpec((1, C), lambda i, h: (0, 0)),     # gamma
                pl.BlockSpec((1, C), lambda i, h: (0, 0)),     # beta
            ],
            out_specs=pl.BlockSpec((tm, C), lambda i, h: (i, 0)),
            scratch_shapes=[pltpu.VMEM((tm, C), jnp.float32)],
        ),
        compiler_params=pltpu.CompilerParams(
            dimension_semantics=("parallel", "arbitrary"),
            vmem_limit_bytes=vmem_limit),
        cost_estimate=cost,
    )(x2d, w1p, b1p, w2p, b2, gamma, beta)
    return out2d.reshape(B, S, C)


# ----------------------------------------------------------------------------
# Test helpers
# ----------------------------------------------------------------------------
def _init_params(key, input_channel, hidden_channel, dtype=jnp.float32):
    """Mimics nn.Linear default init (uniform +/- 1/sqrt(fan_in))."""
    k1, k2, k3, k4 = jax.random.split(key, 4)
    b1_bound = 1.0 / (input_channel ** 0.5)
    b2_bound = 1.0 / (hidden_channel ** 0.5)
    w1 = jax.random.uniform(k1, (input_channel, hidden_channel), jnp.float32,
                            minval=-b1_bound, maxval=b1_bound)
    b1 = jax.random.uniform(k2, (1, hidden_channel), jnp.float32,
                            minval=-b1_bound, maxval=b1_bound)
    w2 = jax.random.uniform(k3, (hidden_channel, input_channel), jnp.float32,
                            minval=-b2_bound, maxval=b2_bound)
    b2 = jax.random.uniform(k4, (1, input_channel), jnp.float32,
                            minval=-b2_bound, maxval=b2_bound)
    gamma = jnp.ones((1, input_channel), jnp.float32)
    beta = jnp.zeros((1, input_channel), jnp.float32)
    return tuple(p.astype(dtype) for p in (w1, b1, w2, b2, gamma, beta))


def _reference(x, w1, b1, w2, b2, gamma, beta, eps=1e-5):
    x = x.astype(jnp.float32)
    w1, b1, w2, b2, gamma, beta = (p.astype(jnp.float32)
                                   for p in (w1, b1, w2, b2, gamma, beta))
    h = jnp.maximum(x @ w1 + b1[0], 0.0)
    f = h @ w2 + b2[0]
    y = x + f
    mean = jnp.mean(y, axis=-1, keepdims=True)
    var = jnp.mean((y - mean) ** 2, axis=-1, keepdims=True)
    return (y - mean) * jax.lax.rsqrt(var + eps) * gamma[0] + beta[0]


if __name__ == "__main__":
    key = jax.random.PRNGKey(0)
    kx, kp, kx2, kx3 = jax.random.split(key, 4)

    # 1) f32, resident-weight fast path, multiple token tiles
    B, S, C, H = 4, 128, 128, 256
    x = jax.random.normal(kx, (B, S, C), jnp.float32)
    params = _init_params(kp, C, H, jnp.float32)
    out = jax.block_until_ready(feed_forward_layer(x, *params))
    ref = _reference(x.reshape(-1, C), *params).reshape(B, S, C)
    assert out.shape == (B, S, C)
    assert jnp.allclose(out, ref, atol=1e-4, rtol=1e-4), "f32 fast-path mismatch"

    # 2) ragged token count (partial trailing token tile, no wrapper-side pad)
    B2, S2, C2, H2 = 2, 13, 128, 192
    x2 = jax.random.normal(kx2, (B2, S2, C2), jnp.float32)
    params2 = _init_params(kp, C2, H2, jnp.float32)
    out2 = jax.block_until_ready(feed_forward_layer(x2, *params2))
    ref2 = _reference(x2.reshape(-1, C2), *params2).reshape(B2, S2, C2)
    assert jnp.allclose(out2, ref2, atol=1e-4, rtol=1e-4), "ragged mismatch"

    # 3) chunked-hidden path (explicit tile_h < H exercises the accumulator)
    B3, S3, C3, H3 = 2, 64, 128, 512
    x3 = jax.random.normal(kx3, (B3, S3, C3), jnp.float32)
    params3 = _init_params(kp, C3, H3, jnp.float32)
    out3 = jax.block_until_ready(
        feed_forward_layer(x3, *params3, tile_m=64, tile_h=256))
    ref3 = _reference(x3.reshape(-1, C3), *params3).reshape(B3, S3, C3)
    assert jnp.allclose(out3, ref3, atol=1e-3, rtol=1e-3), "chunked mismatch"

    # 4) bf16 operands into the MXU (f32 accumulation / LayerNorm)
    x_bf = x.astype(jnp.bfloat16)
    params_bf = tuple(p.astype(jnp.bfloat16) for p in params)
    out_bf = jax.block_until_ready(feed_forward_layer(x_bf, *params_bf))
    ref_bf = _reference(x_bf.reshape(-1, C), *params_bf).reshape(B, S, C)
    assert out_bf.dtype == jnp.bfloat16
    assert jnp.allclose(out_bf.astype(jnp.float32), ref_bf,
                        atol=1e-1, rtol=1e-1), "bf16 mismatch"

    print("KERNEL_OK")
</pallas_src>

<mosaic_0001>
module attributes {stable_mosaic.version = 11 : i64} {
  func.func @_ffn_ln_fused_kernel(%arg0: i32, %arg1: memref<256x128xf32, #tpu.memory_space<vmem>>, %arg2: memref<128x256xf32, #tpu.memory_space<vmem>>, %arg3: memref<1x256xf32, #tpu.memory_space<vmem>>, %arg4: memref<256x128xf32, #tpu.memory_space<vmem>>, %arg5: memref<1x128xf32, #tpu.memory_space<vmem>>, %arg6: memref<1x128xf32, #tpu.memory_space<vmem>>, %arg7: memref<1x128xf32, #tpu.memory_space<vmem>>, %arg8: memref<256x128xf32, #tpu.memory_space<vmem>>) attributes {dimension_semantics = [#tpu.dimension_semantics<parallel>], iteration_bounds = array<i64: 2>, scalar_prefetch = 0 : i64, scratch_operands = 0 : i64, tpu.core_type = #tpu.core_type<tc>, window_params = [{transform_indices = @transform_0, window_bounds = array<i64: 256, 128>}, {pipeline_mode = #tpu.pipeline_mode<synchronous>, transform_indices = @transform_1, window_bounds = array<i64: 128, 256>}, {pipeline_mode = #tpu.pipeline_mode<synchronous>, transform_indices = @transform_2, window_bounds = array<i64: 1, 256>}, {pipeline_mode = #tpu.pipeline_mode<synchronous>, transform_indices = @transform_3, window_bounds = array<i64: 256, 128>}, {pipeline_mode = #tpu.pipeline_mode<synchronous>, transform_indices = @transform_4, window_bounds = array<i64: 1, 128>}, {pipeline_mode = #tpu.pipeline_mode<synchronous>, transform_indices = @transform_5, window_bounds = array<i64: 1, 128>}, {pipeline_mode = #tpu.pipeline_mode<synchronous>, transform_indices = @transform_6, window_bounds = array<i64: 1, 128>}, {transform_indices = @transform_7, window_bounds = array<i64: 256, 128>}]} {
    %c0 = arith.constant 0 : index
    %c0_0 = arith.constant 0 : index
    %0 = vector.load %arg1[%c0, %c0_0] : memref<256x128xf32, #tpu.memory_space<vmem>>, vector<256x128xf32>
    %c0_1 = arith.constant 0 : index
    %c0_2 = arith.constant 0 : index
    %1 = vector.load %arg2[%c0_1, %c0_2] : memref<128x256xf32, #tpu.memory_space<vmem>>, vector<128x256xf32>
    %cst = arith.constant dense<0.000000e+00> : vector<256x256xf32>
    %2 = tpu.matmul %0, %1, %cst {dimension_numbers = #tpu.dot_dimension_numbers<[1], [0], [0], [1], [0, 0, 1, 1], [], []>} : vector<256x128xf32>, vector<128x256xf32>, vector<256x256xf32> -> vector<256x256xf32>
    %c0_3 = arith.constant 0 : index
    %c0_4 = arith.constant 0 : index
    %3 = vector.load %arg3[%c0_3, %c0_4] : memref<1x256xf32, #tpu.memory_space<vmem>>, vector<1x256xf32>
    %4 = vector.broadcast %3 : vector<1x256xf32> to vector<256x256xf32>
    %5 = arith.addf %2, %4 : vector<256x256xf32>
    %cst_5 = arith.constant 0.000000e+00 : f32
    %6 = vector.broadcast %cst_5 : f32 to vector<256x256xf32>
    %7 = arith.maximumf %5, %6 : vector<256x256xf32>
    %c0_6 = arith.constant 0 : index
    %c0_7 = arith.constant 0 : index
    %8 = vector.load %arg4[%c0_6, %c0_7] : memref<256x128xf32, #tpu.memory_space<vmem>>, vector<256x128xf32>
    %cst_8 = arith.constant dense<0.000000e+00> : vector<256x128xf32>
    %9 = tpu.matmul %7, %8, %cst_8 {dimension_numbers = #tpu.dot_dimension_numbers<[1], [0], [0], [1], [0, 0, 1, 1], [], []>} : vector<256x256xf32>, vector<256x128xf32>, vector<256x128xf32> -> vector<256x128xf32>
    %10 = arith.addf %0, %9 : vector<256x128xf32>
    %c0_9 = arith.constant 0 : index
    %c0_10 = arith.constant 0 : index
    %11 = vector.load %arg5[%c0_9, %c0_10] : memref<1x128xf32, #tpu.memory_space<vmem>>, vector<1x128xf32>
    %12 = vector.broadcast %11 : vector<1x128xf32> to vector<256x128xf32>
    %13 = arith.addf %10, %12 : vector<256x128xf32>
    %cst_11 = arith.constant dense<0.000000e+00> : vector<256xf32>
    %14 = vector.multi_reduction <add>, %13, %cst_11 [1] : vector<256x128xf32> to vector<256xf32>
    %15 = vector.shape_cast %14 : vector<256xf32> to vector<256x1xf32>
    %cst_12 = arith.constant 7.812500e-03 : f32
    %16 = vector.broadcast %cst_12 : f32 to vector<256x1xf32>
    %17 = arith.mulf %15, %16 : vector<256x1xf32>
    %18 = arith.mulf %13, %13 : vector<256x128xf32>
    %cst_13 = arith.constant dense<0.000000e+00> : vector<256xf32>
    %19 = vector.multi_reduction <add>, %18, %cst_13 [1] : vector<256x128xf32> to vector<256xf32>
    %20 = vector.shape_cast %19 : vector<256xf32> to vector<256x1xf32>
    %cst_14 = arith.constant 7.812500e-03 : f32
    %21 = vector.broadcast %cst_14 : f32 to vector<256x1xf32>
    %22 = arith.mulf %20, %21 : vector<256x1xf32>
    %23 = arith.mulf %17, %17 : vector<256x1xf32>
    %24 = arith.subf %22, %23 : vector<256x1xf32>
    %cst_15 = arith.constant 9.99999974E-6 : f32
    %25 = vector.broadcast %cst_15 : f32 to vector<256x1xf32>
    %26 = arith.addf %24, %25 : vector<256x1xf32>
    %27 = math.rsqrt %26 : vector<256x1xf32>
    %28 = vector.broadcast %17 : vector<256x1xf32> to vector<256x128xf32>
    %29 = arith.subf %13, %28 : vector<256x128xf32>
    %30 = vector.broadcast %27 : vector<256x1xf32> to vector<256x128xf32>
    %31 = arith.mulf %29, %30 : vector<256x128xf32>
    %c0_16 = arith.constant 0 : index
    %c0_17 = arith.constant 0 : index
    %32 = vector.load %arg6[%c0_16, %c0_17] : memref<1x128xf32, #tpu.memory_space<vmem>>, vector<1x128xf32>
    %33 = vector.broadcast %32 : vector<1x128xf32> to vector<256x128xf32>
    %34 = arith.mulf %31, %33 : vector<256x128xf32>
    %c0_18 = arith.constant 0 : index
    %c0_19 = arith.constant 0 : index
    %35 = vector.load %arg7[%c0_18, %c0_19] : memref<1x128xf32, #tpu.memory_space<vmem>>, vector<1x128xf32>
    %36 = vector.broadcast %35 : vector<1x128xf32> to vector<256x128xf32>
    %37 = arith.addf %34, %36 : vector<256x128xf32>
    %c0_20 = arith.constant 0 : index
    %c0_21 = arith.constant 0 : index
    %38 = vector.load %arg8[%c0_20, %c0_21] : memref<256x128xf32, #tpu.memory_space<vmem>>, vector<256x128xf32>
    tpu.vector_store %arg8[%c0_20, %c0_21], %37 {strides = array<i32>} : memref<256x128xf32, #tpu.memory_space<vmem>>, vector<256x128xf32>,
    return
  }
  func.func @transform_0(%arg0: i32) -> (i32, i32) {
    %c0_i32 = arith.constant 0 : i32
    %c0_i32_0 = arith.constant 0 : i32
    return %arg0, %c0_i32 : i32, i32
  }
  func.func @transform_1(%arg0: i32) -> (i32, i32) {
    %c0_i32 = arith.constant 0 : i32
    %c0_i32_0 = arith.constant 0 : i32
    %c0_i32_1 = arith.constant 0 : i32
    return %c0_i32, %c0_i32_0 : i32, i32
  }
  func.func @transform_2(%arg0: i32) -> (i32, i32) {
    %c0_i32 = arith.constant 0 : i32
    %c0_i32_0 = arith.constant 0 : i32
    %c0_i32_1 = arith.constant 0 : i32
    return %c0_i32, %c0_i32_0 : i32, i32
  }
  func.func @transform_3(%arg0: i32) -> (i32, i32) {
    %c0_i32 = arith.constant 0 : i32
    %c0_i32_0 = arith.constant 0 : i32
    %c0_i32_1 = arith.constant 0 : i32
    return %c0_i32, %c0_i32_0 : i32, i32
  }
  func.func @transform_4(%arg0: i32) -> (i32, i32) {
    %c0_i32 = arith.constant 0 : i32
    %c0_i32_0 = arith.constant 0 : i32
    %c0_i32_1 = arith.constant 0 : i32
    return %c0_i32, %c0_i32_0 : i32, i32
  }
  func.func @transform_5(%arg0: i32) -> (i32, i32) {
    %c0_i32 = arith.constant 0 : i32
    %c0_i32_0 = arith.constant 0 : i32
    %c0_i32_1 = arith.constant 0 : i32
    return %c0_i32, %c0_i32_0 : i32, i32
  }
  func.func @transform_6(%arg0: i32) -> (i32, i32) {
    %c0_i32 = arith.constant 0 : i32
    %c0_i32_0 = arith.constant 0 : i32
    %c0_i32_1 = arith.constant 0 : i32
    return %c0_i32, %c0_i32_0 : i32, i32
  }
  func.func @transform_7(%arg0: i32) -> (i32, i32) {
    %c0_i32 = arith.constant 0 : i32
    %c0_i32_0 = arith.constant 0 : i32
    return %arg0, %c0_i32 : i32, i32
  }
}

</mosaic_0001>

<bundles_post_ra>
// kernel: tpu_custom_call.1
= control target key start
LH: loop header
LB: loop body
LE: loop exit
PB: predicated region body
PF: predicated region fallthrough
CT: control target
= control target key end

     0   :  { %12 = vsyncpa [#allocation3], 0  ;;  %s3178_s0 = inlined_call_operand.hbm [shape: f32[512,128], index: 0, kind: input, shape index: {}]   ;;  %s3179_s1 = inlined_call_operand.hbm [shape: f32[128,256], index: 1, kind: input, shape index: {}]   ;;  %s3180_s2 = inlined_call_operand.vmem [shape: f32[1,256], index: 2, kind: input, shape index: {}]   ;;  %s3181_s3 = inlined_call_operand.hbm [shape: f32[256,128], index: 3, kind: input, shape index: {}]   ;;  %s3182_s4 = inlined_call_operand.vmem [shape: f32[1,128], index: 4, kind: input, shape index: {}]   ;;  %s3183_s5 = inlined_call_operand.vmem [shape: f32[1,128], index: 5, kind: input, shape index: {}]   ;;  %s3184_s6 = inlined_call_operand.vmem [shape: f32[1,128], index: 6, kind: input, shape index: {}]   ;;  %s3185_s7 = inlined_call_operand.hbm [shape: f32[512,128], index: 7, kind: output, shape index: {}]  }
   0x1   :  { %14 = vsyncpa [#allocation3 + $0x1], 0 }
   0x2   :  { %15 = vsyncpa [#allocation6], 0 }
   0x3   :  { %16 = vsyncpa [#allocation4], 0 }
   0x4   :  { %18 = vsyncpa [#allocation4 + $0x1], 0  ;;  %s2169_s24 = smov 0   ;;  %s2171_s25 = smov 0  }
   0x5   :  { %s2173_s26 = smov 0   ;;  %s2175_s27 = smov 0  }
   0x6 LB: > { %s2190_s28 = sadd.s32 4294967295, %s2115_s27   ;;  %s1685_s29 = sadd.s32 4294967294, %s2115_s27   ;;  %s2115_s27 = sphi %s2175_s27, %s3207_s27   ;;  %s2111_s26 = sphi %s2173_s26, %s3206_s26   ;;  %s2107_s25 = sphi %s2171_s25, %s3205_s25   ;;  %s2103_s24 = sphi %s2169_s24, %s3204_s24  }
   0x7   : > { %p44_p0 = scmp.ne.s32.totalorder %s2107_s25, %s2103_s24  ;;  %p3186_p1 = scmp.eq.s32.totalorder %s2190_s28, 0 }
   0x8   : > { %p200_p3 = scmp.eq.s32.totalorder %s1685_s29, 1  ;;  %p1686_p5 = scmp.ge.s32.totalorder %s2115_s27, 1 }
   0x9   : > { %p2199_p4 = por %p3186_p1, %p44_p0  ;;  %p207_p7 = scmp.lt.s32.totalorder %s2115_s27, 3 }
   0xa   : > { %p2204_p6 = por %p200_p3, %p44_p0  ;;  %s2117_s10 = smov [#allocation5]  }
   0xb   : > { %s3190_s30 = scalar_select %p2199_p4, 1, 0 }
   0xc   : > { %s3191_s8 = scalar_select %p2204_p6, 1, 0 }
   0xd   : > { %p2209_p8 = pnand %p1686_p5, %p207_p7  ;;  %s219_s11 = sshll.u32 %s2117_s10, 4  ;;  %s2213_s11 = int_to_ptr.vmem [resolvable:$true] %s219_s11 }
   0xe   : > { %s2118_s13 = smov [#allocation7]   ;;  %s1959_s17 = scalar_lea.hbm %s3179_s1, 4096 }
   0xf   : > { %p1832_p9 = pneg %p2209_p8  ;;  %s235_s14 = sshll.u32 %s2118_s13, 4  ;;  %s2224_s14 = int_to_ptr.vmem [resolvable:$true] %s235_s14 }
  0x10   : > { %p1960_p12 = scmp.ne.s32.totalorder %s3179_s1, %s1959_s17  ;;  %p1966_p5 = scmp.lt.u32.totalorder %s1959_s17, %s3179_s1 }
  0x11   : > { %p2220_p11 = pnand %p1832_p9, %p3186_p1 }
  0x13   : > { %p1961_p13 = pneg %p2220_p11 }
  0x15   : > { %p1962_p0 = pnand %p1961_p13, %p1960_p12 }
  0x17   : > { %p1963_p3 = pneg %p1962_p0 }
  0x19   : > { %p1968_p7 = pnand %p1966_p5, %p1963_p3 }
  0x1b   : > { %1971 = shalt.err (!%p1968_p7)
}
  0x1c   : > { %s1972_s22 = scalar_lea.vmem %s2213_s11, 4096  ;;  %p1980_p2 = scmp.lt.s32.totalorder %s2213_s11, %s2213_s11 }
  0x1d   : > { %p1973_p9 = scmp.ne.s32.totalorder %s2213_s11, %s1972_s22  ;;  %p1981_p12 = scmp.lt.s32.totalorder %s1972_s22, %s1972_s22 }
  0x1f   : > { %p1975_p10 = pnand %p1973_p9, %p1961_p13  ;;  %p1982_p0 = por %p1981_p12, %p1980_p2 }
  0x21   : > { %p1976_p1 = pneg %p1975_p10 }
  0x23   : > { %p1983_p6 = pnand %p1982_p0, %p1976_p1 }
  0x25   : > { %1986 = shalt.err (!%p1983_p6)
}
  0x26   : > { %s2119_s23 = smov 256   ;;  %s2120_s29 = smov 16  }
  0x27   : > { %1835 = dma.hbm_to_vmem [thread:$0]  (!%p2220_p11), %s3179_s1, 4096, %s2213_s11, [#allocation6], %s2119_s23, %s2119_s23, %s2120_s29  }
  0x28   : > { %s1987_s17 = scalar_lea.hbm %s3181_s3, 4096 }
  0x29   : > { %p1988_p2 = scmp.ne.s32.totalorder %s3181_s3, %s1987_s17  ;;  %p1994_p10 = scmp.lt.u32.totalorder %s1987_s17, %s3181_s3 }
  0x2b   : > { %p1990_p1 = pnand %p1988_p2, %p1961_p13 }
  0x2d   : > { %p1991_p6 = pneg %p1990_p1 }
  0x2f   : > { %p1996_p3 = pnand %p1994_p10, %p1991_p6 }
  0x31   : > { %1999 = shalt.err (!%p1996_p3)
}
  0x32   : > { %s2000_s11 = scalar_lea.vmem %s2224_s14, 4096  ;;  %p2008_p12 = scmp.lt.s32.totalorder %s2224_s14, %s2224_s14 }
  0x33   : > { %p2001_p5 = scmp.ne.s32.totalorder %s2224_s14, %s2000_s11  ;;  %p2009_p0 = scmp.lt.s32.totalorder %s2000_s11, %s2000_s11 }
  0x35   : > { %p2003_p7 = pnand %p2001_p5, %p1961_p13  ;;  %p2010_p2 = por %p2009_p0, %p2008_p12 }
  0x37   : > { %p2004_p9 = pneg %p2003_p7 }
  0x39   : > { %p2011_p1 = pnand %p2010_p2, %p2004_p9 }
  0x3b   : > { %2014 = shalt.err (!%p2011_p1)
}
  0x3c   : > { %s3187_s22 = smov 128   ;;  %s2122_s23 = smov 8  }
  0x3d   : > { %1838 = dma.hbm_to_vmem [thread:$0]  (!%p2220_p11), %s3181_s3, 4096, %s2224_s14, [#allocation6], %s3187_s22, %s3187_s22, %s2122_s23  }
  0x3e   : > { %s2282_s13 = sadd.s32 1, %s2115_s27   ;;  %s31_s16 = sadd.s32 1, %s2111_s26 }
  0x3f   : > { %s28_s15 = ssub.s32 %s2115_s27, %s2282_s13  ;;  %p38_p6 = scmp.ne.s32.totalorder %s2111_s26, %s2107_s25 }
  0x40   : > { %p29_p13 = scmp.eq.s32.totalorder %s28_s15, 0  ;;  %p39_p10 = scmp.eq.s32.totalorder %s2115_s27, 0 }
  0x41   : > { %p3194_p5 = scmp.eq.s32.totalorder %s2190_s28, 1  ;;  %p1849_p9 = scmp.lt.s32.totalorder %s2115_s27, 2 }
  0x42   : > { %s2291_s17 = scalar_select %p29_p13, %s2111_s26, %s31_s16  }
  0x43   : > { %p40_p3 = por %p39_p10, %p38_p6  ;;  %p2295_p7 = por %p3194_p5, %p38_p6 }
  0x44   : > { %s258_s18 = sand.u32 1, %s2111_s26   ;;  %s1706_s14 = sshll.u32 %s2115_s27, 12 }
  0x45   : > { %s3195_s12 = scalar_select %p2295_p7, 1, 0 }
  0x46   : > { %s1690_s19 = sshll.u32 %s258_s18, 8  ;;  %s2305_s11 = scalar_lea.hbm %s3178_s0, %s1706_s14 }
  0x47   : > { %s262_s29 = scalar_lea.vmem [#allocation2], %s1690_s19  ;;  %p2309_p11 = pnand %p1849_p9, %p40_p3 }
  0x48   : > { %s269_s10 = sshll.u32 %s262_s29, 4  ;;  %s2313_s16 = scalar_lea.sflag [#allocation3], %s258_s18  ;;  %s2307_s10 = int_to_ptr.vmem [resolvable:$true] %s269_s10 }
  0x49   : > { %s2015_s22 = scalar_lea.hbm %s2305_s11, 4096  ;;  %p2017_p0 = pneg %p2309_p11 }
  0x4a   : > { %p2016_p12 = scmp.ne.s32.totalorder %s2305_s11, %s2015_s22  ;;  %s2020_s20 = scalar_lea.hbm %s3178_s0, 8192 }
  0x4b   : > { %p2021_p13 = scmp.lt.u32.totalorder %s2305_s11, %s3178_s0  ;;  %p2022_p6 = scmp.lt.u32.totalorder %s2020_s20, %s2015_s22 }
  0x4c   : > { %p2018_p2 = pnand %p2017_p0, %p2016_p12  ;;  %p2024_p3 = scmp.lt.u32.totalorder %s2015_s22, %s2305_s11 }
  0x4d   : > { %p2023_p10 = por %p2022_p6, %p2021_p13 }
  0x4e   : > { %p2019_p1 = pneg %p2018_p2 }
  0x4f   : > { %p2025_p5 = por %p2024_p3, %p2023_p10 }
  0x51   : > { %p2026_p9 = pnand %p2025_p5, %p2019_p1 }
  0x53   : > { %2029 = shalt.err (!%p2026_p9)
}
  0x54   : > { %s2030_s18 = scalar_lea.vmem %s2307_s10, 4096  ;;  %s2123_s19 = smov [#allocation2]  }
  0x55   : > { %p2031_p12 = scmp.ne.s32.totalorder %s2307_s10, %s2030_s18  ;;  %s2035_s14 = sshll.u32 %s2123_s19, 4  ;;  %s2036_s14 = int_to_ptr.vmem [resolvable:$false] %s2035_s14 }
  0x56   : > { %s2037_s21 = scalar_lea.vmem %s2036_s14, 8192  ;;  %p2038_p4 = scmp.lt.s32.totalorder %s2307_s10, %s2036_s14 }
  0x57   : > { %p2033_p2 = pnand %p2031_p12, %p2017_p0  ;;  %p2039_p13 = scmp.lt.s32.totalorder %s2037_s21, %s2030_s18 }
  0x59   : > { %p2034_p7 = pneg %p2033_p2  ;;  %p2040_p6 = por %p2039_p13, %p2038_p4 }
  0x5b   : > { %p2041_p10 = pnand %p2040_p6, %p2034_p7 }
  0x5d   : > { %2044 = shalt.err (!%p2041_p10)
}
  0x5e   : > { %s3197_s22 = smov 128   ;;  %281 = sbr.rel (%p2209_p8) target bundleno = 884 (0x374), region = 48 }
  0x5f   : > { %1842 = dma.hbm_to_vmem [thread:$0]  (!%p2309_p11), %s2305_s11, 4096, %s2307_s10, %s2313_s16, %s3197_s22, %s3197_s22, %s2122_s23  }
  0x60   : > { %s2347_s20 = sand.u32 (!%p2209_p8), 1, %s2107_s25   ;;  %p3198_p4 = scmp.ne.s32.totalorder (!%p2209_p8), %s3190_s30, 0 }
  0x61   : > { %s1694_s29 = sshll.u32 (!%p2209_p8), %s2347_s20, 8  ;;  %s284_s18 = scalar_lea.sflag (!%p2209_p8), [#allocation3], %s2347_s20 }
  0x62   : > { %s2353_s15 = scalar_lea.vmem (!%p2209_p8), [#allocation2], %s1694_s29 }
  0x65   : > { %2090 = dma.done.wait (%p3198_p4), %s284_s18, 4096  }
  0x66   : > { %2092 = vsyncadd (%p3198_p4), %s284_s18, 4294963200  ;;  %p3199_p7 = scmp.eq.s32.totalorder %s2190_s28, 0 }
  0x68   : > { %2094 = dma.done.wait (%p3199_p7), [#allocation6], 8192   ;;  %p3200_p8 = pmov %p3199_p7 }
  0x69   : > { %v2124_v0 = vmov 0.0   ;;  %v2125_v1 = vmov 0.0|0.0   ;;  %v361_v2 = vld [vmem:[#allocation5 + $0x8] sm:$0xff]  ;;  %v363_v3 = vld [vmem:[#allocation5 + $0x18] sm:$0xff]  ;;  %v360_v4 = vld [vmem:[#allocation5] sm:$0xff]  ;;  %s2885_s21 = scalar_lea.vmem [#allocation8], %s1694_s29 }
  0x6a   : > { %2096 = vsyncadd (%p3200_p8), [#allocation6], 4294959104  ;;  %468 = vmatprep.mubr.f32.mxu0 %v2124_v0  ;;  %1788 = vmatprep.subr.bf16.mxu1 %v2125_v1  ;;  %v1708_v5 = vpack.c.bf16 %v363_v3, %v361_v2  ;;  %v362_v6 = vld [vmem:[#allocation5 + $0x10] sm:$0xff]  ;;  %v365_v7 = vld [vmem:[#allocation5 + $0x28] sm:$0xff]  ;;  %s1707_s22 = sshll.u32 %s2190_s28, 12  ;;  %s1593_s29 = sshll.u32 %s2885_s21, 4  ;;  %s3132_s29 = int_to_ptr.vmem [resolvable:$true] %s1593_s29 }
  0x6b   : > { %v367_v8 = vld [vmem:[#allocation5 + $0x38] sm:$0xff]  ;;  %v1710_v9 = vpack.c.bf16 %v362_v6, %v360_v4  ;;  %v364_v11 = vld [vmem:[#allocation5 + $0x20] sm:$0xff]  ;;  %v366_v12 = vld [vmem:[#allocation5 + $0x30] sm:$0xff]  ;;  %s3130_s30 = scalar_lea.hbm %s3185_s7, %s1707_s22  ;;  %s1580_s9 = scalar_lea.sflag [#allocation4], %s2347_s20 }
  0x6c   : > { %v1712_v10 = vpack.c.bf16 %v367_v8, %v365_v7  ;;  %v369_v13 = vld [vmem:[#allocation5 + $0x48] sm:$0xff]  ;;  %1709 = vmatprep.subr.bf16.mxu0 %v1708_v5  ;;  %v371_v14 = vld [vmem:[#allocation5 + $0x58] sm:$0xff]  ;;  %v1714_v15 = vpack.c.bf16 %v366_v12, %v364_v11  ;;  %v368_v17 = vld [vmem:[#allocation5 + $0x40] sm:$0xff]  ;;  %s2045_s23 = scalar_lea.vmem %s3132_s29, 4096  ;;  %p3201_p0 = scmp.ne.s32.totalorder %s3195_s12, 0 }
  0x6d   : > { %1711 = vmatpush1.bf16.msra.mxu0 %v1710_v9  ;;  %v1716_v16 = vpack.c.bf16 %v371_v14, %v369_v13  ;;  %v370_v18 = vld [vmem:[#allocation5 + $0x50] sm:$0xff]  ;;  %v373_v19 = vld [vmem:[#allocation5 + $0x68] sm:$0xff]  ;;  %v375_v20 = vld [vmem:[#allocation5 + $0x78] sm:$0xff]  ;;  %p2046_p11 = scmp.ne.s32.totalorder %s3132_s29, %s2045_s23  ;;  %s2126_s28 = smov [#allocation8]  }
  0x6e   : > { %1713 = vmatprep.subr.bf16.mxu0 %v1712_v10  ;;  %v1718_v21 = vpack.c.bf16 %v370_v18, %v368_v17  ;;  %v1720_v22 = vpack.c.bf16 %v375_v20, %v373_v19  ;;  %v372_v23 = vld [vmem:[#allocation5 + $0x60] sm:$0xff]  ;;  %v374_v24 = vld [vmem:[#allocation5 + $0x70] sm:$0xff]  ;;  %v377_v25 = vld [vmem:[#allocation5 + $0x88] sm:$0xff]  ;;  %s2049_s11 = sshll.u32 %s2126_s28, 4  ;;  %s2050_s11 = int_to_ptr.vmem [resolvable:$false] %s2049_s11 }
  0x6f   : > { %v379_v26 = vld [vmem:[#allocation5 + $0x98] sm:$0xff]  ;;  %v1722_v27 = vpack.c.bf16 %v374_v24, %v372_v23  ;;  %v376_v29 = vld [vmem:[#allocation5 + $0x80] sm:$0xff]  ;;  %v378_v30 = vld [vmem:[#allocation5 + $0x90] sm:$0xff]  ;;  %p2047_p1 = pnand %p2046_p11, %p3201_p0  ;;  %s2051_s10 = scalar_lea.vmem %s2050_s11, 8192 }
  0x70   : > { %v1724_v28 = vpack.c.bf16 %v379_v26, %v377_v25  ;;  %v381_v31 = vld [vmem:[#allocation5 + $0xa8] sm:$0xff]  ;;  %v383_v32 = vld [vmem:[#allocation5 + $0xb8] sm:$0xff]  ;;  %v1726_v33 = vpack.c.bf16 %v378_v30, %v376_v29  ;;  %v380_v35 = vld [vmem:[#allocation5 + $0xa0] sm:$0xff]  ;;  %p2052_p5 = scmp.lt.s32.totalorder %s3132_s29, %s2050_s11  ;;  %p2053_p9 = scmp.lt.s32.totalorder %s2051_s10, %s2045_s23 }
  0x71   : > { %1715 = vmatpush1.bf16.msra.mxu0 %v1714_v15  ;;  %v1728_v34 = vpack.c.bf16 %v383_v32, %v381_v31  ;;  %v382_v36 = vld [vmem:[#allocation5 + $0xb0] sm:$0xff]  ;;  %v385_v37 = vld [vmem:[#allocation5 + $0xc8] sm:$0xff]  ;;  %v387_v38 = vld [vmem:[#allocation5 + $0xd8] sm:$0xff]  ;;  %p2048_p3 = pneg %p2047_p1 }
  0x72   : > { %1717 = vmatprep.subr.bf16.mxu0 %v1716_v16  ;;  %v725_v39 = vld [vmem:[#allocation7] sm:$0xff]  ;;  %v726_v40 = vld [vmem:[#allocation7 + $0x8] sm:$0xff]  ;;  %v1730_v42 = vpack.c.bf16 %v382_v36, %v380_v35  ;;  %v727_v43 = vld [vmem:[#allocation7 + $0x10] sm:$0xff]  ;;  %v1732_v45 = vpack.c.bf16 %v387_v38, %v385_v37  ;;  %p2054_p12 = por %p2053_p9, %p2052_p5 }
  0x73   : > { %v1741_v41 = vpack.c.bf16 %v726_v40, %v725_v39  ;;  %v728_v44 = vld [vmem:[#allocation7 + $0x18] sm:$0xff]  ;;  %v384_v46 = vld [vmem:[#allocation5 + $0xc0] sm:$0xff]  ;;  %v386_v47 = vld [vmem:[#allocation5 + $0xd0] sm:$0xff] }
  0x74   : > { %v389_v48 = vld [vmem:[#allocation5 + $0xe8] sm:$0xff]  ;;  %v391_v49 = vld [vmem:[#allocation5 + $0xf8] sm:$0xff]  ;;  %v1744_v50 = vpack.c.bf16 %v728_v44, %v727_v43  ;;  %v1734_v51 = vpack.c.bf16 %v386_v47, %v384_v46  ;;  %v729_v52 = vld [vmem:[#allocation7 + $0x20] sm:$0xff]  ;;  %p2055_p2 = pnand %p2054_p12, %p2048_p3 }
  0x75   : > { %1719 = vmatpush1.bf16.msra.mxu0 %v1718_v21  ;;  %1804 = vmatpush1.bf16.msra.mxu1 %v1741_v41  ;;  %v730_v53 = vld [vmem:[#allocation7 + $0x28] sm:$0xff]  ;;  %v1736_v54 = vpack.c.bf16 %v391_v49, %v389_v48  ;;  %v388_v55 = vld [vmem:[#allocation5 + $0xe0] sm:$0xff]  ;;  %v390_v56 = vld [vmem:[#allocation5 + $0xf0] sm:$0xff] }
  0x76   : > { %1721 = vmatprep.subr.bf16.mxu0 %v1720_v22  ;;  %1789 = vmatprep.subr.bf16.mxu1 %v2125_v1  ;;  %v1747_v57 = vpack.c.bf16 %v730_v53, %v729_v52  ;;  %v1738_v58 = vpack.c.bf16 %v390_v56, %v388_v55  ;;  %v731_v59 = vld [vmem:[#allocation7 + $0x30] sm:$0xff]  ;;  %v732_v60 = vld [vmem:[#allocation7 + $0x38] sm:$0xff]  ;;  %v2369_v62 = vld [vmem:[%s2353_s15] sm:$0xff] }
  0x77   : > { %v1750_v61 = vpack.c.bf16 %v732_v60, %v731_v59  ;;  %v733_v63 = vld [vmem:[#allocation7 + $0x40] sm:$0xff]  ;;  %v734_v2 = vld [vmem:[#allocation7 + $0x48] sm:$0xff]  ;;  %v735_v5 = vld [vmem:[#allocation7 + $0x50] sm:$0xff] }
  0x78   : > { %v1753_v3 = vpack.c.bf16 %v734_v2, %v733_v63  ;;  %v2376_v4 = vld [vmem:[%s2353_s15 + $0x8] sm:$0xff]  ;;  %v736_v6 = vld [vmem:[#allocation7 + $0x58] sm:$0xff]  ;;  %v2383_v8 = vld [vmem:[%s2353_s15 + $0x10] sm:$0xff] }
  0x79   : > { %1723 = vmatpush1.bf16.msra.mxu0 %v1722_v27  ;;  %1805 = vmatpush1.bf16.msra.mxu1 %v1744_v50  ;;  %v1756_v7 = vpack.c.bf16 %v736_v6, %v735_v5  ;;  %v737_v9 = vld [vmem:[#allocation7 + $0x60] sm:$0xff]  ;;  %v738_v10 = vld [vmem:[#allocation7 + $0x68] sm:$0xff]  ;;  %v2390_v12 = vld [vmem:[%s2353_s15 + $0x18] sm:$0xff] }
  0x7a   : > { %1725 = vmatprep.subr.bf16.mxu0 %v1724_v28  ;;  %1790 = vmatprep.subr.bf16.mxu1 %v2125_v1  ;;  %v1759_v11 = vpack.c.bf16 %v738_v10, %v737_v9  ;;  %v739_v13 = vld [vmem:[#allocation7 + $0x70] sm:$0xff]  ;;  %v740_v14 = vld [vmem:[#allocation7 + $0x78] sm:$0xff]  ;;  %v2397_v16 = vld [vmem:[%s2353_s15 + $0x20] sm:$0xff] }
  0x7b   : > { %v1762_v15 = vpack.c.bf16 %v740_v14, %v739_v13  ;;  %v741_v17 = vld [vmem:[#allocation7 + $0x80] sm:$0xff]  ;;  %v742_v18 = vld [vmem:[#allocation7 + $0x88] sm:$0xff]  ;;  %v743_v21 = vld [vmem:[#allocation7 + $0x90] sm:$0xff] }
  0x7c   : > { %v1765_v19 = vpack.c.bf16 %v742_v18, %v741_v17  ;;  %v2404_v20 = vld [vmem:[%s2353_s15 + $0x28] sm:$0xff]  ;;  %v744_v22 = vld [vmem:[#allocation7 + $0x98] sm:$0xff]  ;;  %v2411_v24 = vld [vmem:[%s2353_s15 + $0x30] sm:$0xff] }
  0x7d   : > { %1727 = vmatpush1.bf16.msra.mxu0 %v1726_v33  ;;  %1806 = vmatpush1.bf16.msra.mxu1 %v1747_v57  ;;  %v1768_v23 = vpack.c.bf16 %v744_v22, %v743_v21  ;;  %v745_v25 = vld [vmem:[#allocation7 + $0xa0] sm:$0xff]  ;;  %v746_v26 = vld [vmem:[#allocation7 + $0xa8] sm:$0xff]  ;;  %v2418_v28 = vld [vmem:[%s2353_s15 + $0x38] sm:$0xff] }
  0x7e   : > { %1729 = vmatprep.subr.bf16.mxu0 %v1728_v34  ;;  %1791 = vmatprep.subr.bf16.mxu1 %v2125_v1  ;;  %v1771_v27 = vpack.c.bf16 %v746_v26, %v745_v25  ;;  %v747_v29 = vld [vmem:[#allocation7 + $0xb0] sm:$0xff]  ;;  %v748_v30 = vld [vmem:[#allocation7 + $0xb8] sm:$0xff]  ;;  %v2425_v32 = vld [vmem:[%s2353_s15 + $0x40] sm:$0xff] }
  0x7f   : > { %v1774_v31 = vpack.c.bf16 %v748_v30, %v747_v29  ;;  %v749_v33 = vld [vmem:[#allocation7 + $0xc0] sm:$0xff]  ;;  %v750_v34 = vld [vmem:[#allocation7 + $0xc8] sm:$0xff]  ;;  %v751_v37 = vld [vmem:[#allocation7 + $0xd0] sm:$0xff] }
  0x80   : > { %v1777_v35 = vpack.c.bf16 %v750_v34, %v749_v33  ;;  %v2432_v36 = vld [vmem:[%s2353_s15 + $0x48] sm:$0xff]  ;;  %v752_v38 = vld [vmem:[#allocation7 + $0xd8] sm:$0xff]  ;;  %v2439_v40 = vld [vmem:[%s2353_s15 + $0x50] sm:$0xff] }
  0x81   : > { %1731 = vmatpush1.bf16.msra.mxu0 %v1730_v42  ;;  %1807 = vmatpush1.bf16.msra.mxu1 %v1750_v61  ;;  %v1780_v39 = vpack.c.bf16 %v752_v38, %v751_v37  ;;  %v754_v42 = vld [vmem:[#allocation7 + $0xe8] sm:$0xff]  ;;  %v2446_v44 = vld [vmem:[%s2353_s15 + $0x58] sm:$0xff]  ;;  %v2453_v48 = vld [vmem:[%s2353_s15 + $0x60] sm:$0xff] }
  0x82   : > { %1733 = vmatprep.subr.bf16.mxu0 %v1732_v45  ;;  %1792 = vmatprep.subr.bf16.mxu1 %v2125_v1  ;;  %v755_v45 = vld [vmem:[#allocation7 + $0xf0] sm:$0xff]  ;;  %v756_v46 = vld [vmem:[#allocation7 + $0xf8] sm:$0xff]  ;;  %v2459_v49 = vld [vmem:[%s2353_s15 + $0x68] sm:$0xff] }
  0x83   : > { %v1786_v47 = vpack.c.bf16 %v756_v46, %v755_v45  ;;  %v2477_v52 = vld [vmem:[%s2353_s15 + $0x80] sm:$0xff]  ;;  %v2482_v53 = vld [vmem:[%s2353_s15 + $0x88] sm:$0xff]  ;;  %v2532_v63 = vld [vmem:[%s2353_s15 + $0xd8] sm:$0xff] }
  0x84   : > { %v2497_v55 = vld [vmem:[%s2353_s15 + $0xa0] sm:$0xff]  ;;  %v2502_v56 = vld [vmem:[%s2353_s15 + $0xa8] sm:$0xff]  ;;  %v2547_v5 = vld [vmem:[%s2353_s15 + $0xf0] sm:$0xff] }
  0x85   : > { %1735 = vmatpush1.bf16.msra.mxu0 %v1734_v51  ;;  %1808 = vmatpush1.bf16.msra.mxu1 %v1753_v3  ;;  %v2471_v51 = vld [vmem:[%s2353_s15 + $0x78] sm:$0xff]  ;;  %v2517_v59 = vld [vmem:[%s2353_s15 + $0xc0] sm:$0xff]  ;;  %v2522_v60 = vld [vmem:[%s2353_s15 + $0xc8] sm:$0xff] }
  0x86   : > { %1737 = vmatprep.subr.bf16.mxu0 %v1736_v54  ;;  %1793 = vmatprep.subr.bf16.mxu1 %v2125_v1  ;;  %v2492_v54 = vld [vmem:[%s2353_s15 + $0x98] sm:$0xff]  ;;  %v2537_v2 = vld [vmem:[%s2353_s15 + $0xe0] sm:$0xff] }
  0x87   : > { %v2552_v6 = vld [vmem:[%s2353_s15 + $0xf8] sm:$0xff] }
  0x89   : > { %1739 = vmatpush1.bf16.msra.mxu0 %v1738_v58  ;;  %1809 = vmatpush1.bf16.msra.mxu1 %v1756_v7  ;;  %v2512_v58 = vld [vmem:[%s2353_s15 + $0xb8] sm:$0xff] }
  0x8a   : > { %1740 = vmatprep.subr.bf16.mxu0 %v2125_v1  ;;  %1794 = vmatprep.subr.bf16.mxu1 %v2125_v1 }
  0x8c   : > { %469 = vmatmul.mubr.f32.vlgmr.msra.gmra.mrb[0].mxu0 %v2369_v62 }
  0x8d   : > { %474 = vmatprep.mubr.f32.mxu0 %v2124_v0  ;;  %1742 = vmatpush1.bf16.msra.mxu0 %v1741_v41  ;;  %v753_v41 = vld [vmem:[#allocation7 + $0xe0] sm:$0xff] }
  0x8e   : > { %1743 = vmatprep.subr.bf16.mxu0 %v2125_v1  ;;  %1810 = vmatpush1.bf16.msra.mxu1 %v1759_v11  ;;  %v1783_v43 = vpack.c.bf16 %v754_v42, %v753_v41 }
  0x8f   : > { %1795 = vmatprep.subr.bf16.mxu1 %v2125_v1 }
  0x90   : > { %475 = vmatmul.mubr.f32.gmra.mrb[2].mxu0 %v2376_v4 }
  0x91   : > { %480 = vmatprep.mubr.f32.mxu0 %v2124_v0  ;;  %1745 = vmatpush1.bf16.msra.mxu0 %v1744_v50  ;;  %v2465_v50 = vld [vmem:[%s2353_s15 + $0x70] sm:$0xff] }
  0x92   : > { %1746 = vmatprep.subr.bf16.mxu0 %v2125_v1  ;;  %1811 = vmatpush1.bf16.msra.mxu1 %v1762_v15 }
  0x93   : > { %1796 = vmatprep.subr.bf16.mxu1 %v2125_v1 }
  0x94   : > { %481 = vmatmul.mubr.f32.gmra.mrb[4].mxu0 %v2383_v8 }
  0x95   : > { %486 = vmatprep.mubr.f32.mxu0 %v2124_v0  ;;  %1748 = vmatpush1.bf16.msra.mxu0 %v1747_v57  ;;  %v2507_v57 = vld [vmem:[%s2353_s15 + $0xb0] sm:$0xff] }
  0x96   : > { %1749 = vmatprep.subr.bf16.mxu0 %v2125_v1  ;;  %1812 = vmatpush1.bf16.msra.mxu1 %v1765_v19 }
  0x97   : > { %1797 = vmatprep.subr.bf16.mxu1 %v2125_v1 }
  0x98   : > { %487 = vmatmul.mubr.f32.gmra.mrb[6].mxu0 %v2390_v12 }
  0x99   : > { %492 = vmatprep.mubr.f32.mxu0 %v2124_v0  ;;  %1751 = vmatpush1.bf16.msra.mxu0 %v1750_v61  ;;  %v2527_v61 = vld [vmem:[%s2353_s15 + $0xd0] sm:$0xff] }
  0x9a   : > { %1752 = vmatprep.subr.bf16.mxu0 %v2125_v1  ;;  %1813 = vmatpush1.bf16.msra.mxu1 %v1768_v23 }
  0x9b   : > { %1798 = vmatprep.subr.bf16.mxu1 %v2125_v1 }
  0x9c   : > { %493 = vmatmul.mubr.f32.gmra.mrb[8].mxu0 %v2397_v16 }
  0x9d   : > { %498 = vmatprep.mubr.f32.mxu0 %v2124_v0  ;;  %1754 = vmatpush1.bf16.msra.mxu0 %v1753_v3  ;;  %v2542_v3 = vld [vmem:[%s2353_s15 + $0xe8] sm:$0xff] }
  0x9e   : > { %1755 = vmatprep.subr.bf16.mxu0 %v2125_v1  ;;  %1814 = vmatpush1.bf16.msra.mxu1 %v1771_v27 }
  0x9f   : > { %1799 = vmatprep.subr.bf16.mxu1 %v2125_v1 }
  0xa0   : > { %499 = vmatmul.mubr.f32.gmra.mrb[10].mxu0 %v2404_v20 }
  0xa1   : > { %504 = vmatprep.mubr.f32.mxu0 %v2124_v0  ;;  %1757 = vmatpush1.bf16.msra.mxu0 %v1756_v7  ;;  %v394_v7 = vlaneseq }
  0xa2   : > { %1758 = vmatprep.subr.bf16.mxu0 %v2125_v1  ;;  %1815 = vmatpush1.bf16.msra.mxu1 %v1774_v31 }
  0xa3   : > { %1800 = vmatprep.subr.bf16.mxu1 %v2125_v1  ;;  %v395_v9 = vshrl.u32 %v394_v7, 7 }
  0xa4   : > { %505 = vmatmul.mubr.f32.gmra.mrb[12].mxu0 %v2411_v24 }
  0xa5   : > { %510 = vmatprep.mubr.f32.mxu0 %v2124_v0  ;;  %1760 = vmatpush1.bf16.msra.mxu0 %v1759_v11  ;;  %v396_v10 = vsub.s32 0, %v395_v9  ;;  %v392_v11 = vld [vmem:[%s3180_s2] sm:$0x3]  ;;  %v400_v13 = vsub.s32 1, %v395_v9 }
  0xa6   : > { %1761 = vmatprep.subr.bf16.mxu0 %v2125_v1  ;;  %1816 = vmatpush1.bf16.msra.mxu1 %v1777_v35 }
  0xa7   : > { %1801 = vmatprep.subr.bf16.mxu1 %v2125_v1  ;;  %v2558_v14 = vrot.slane %v392_v11, %v396_v10 }
  0xa8   : > { %511 = vmatmul.mubr.f32.gmra.mrb[14].mxu0 %v2418_v28 }
  0xa9   : > { %516 = vmatprep.mubr.f32.mxu0 %v2124_v0  ;;  %1763 = vmatpush1.bf16.msra.mxu0 %v1762_v15  ;;  %v2560_v15 = vrot.slane %v392_v11, %v400_v13 }
  0xaa   : > { %1764 = vmatprep.subr.bf16.mxu0 %v2125_v1  ;;  %1817 = vmatpush1.bf16.msra.mxu1 %v1780_v39 }
  0xab   : > { %1802 = vmatprep.subr.bf16.mxu1 %v2125_v1 }
  0xac   : > { %517 = vmatmul.mubr.f32.gmra.mrb[16].mxu0 %v2425_v32 }
  0xad   : > { %522 = vmatprep.mubr.f32.mxu0 %v2124_v0  ;;  %1766 = vmatpush1.bf16.msra.mxu0 %v1765_v19 }
  0xae   : > { %1767 = vmatprep.subr.bf16.mxu0 %v2125_v1  ;;  %1818 = vmatpush1.bf16.msra.mxu1 %v1783_v43 }
  0xaf   : > { %1803 = vmatprep.subr.bf16.mxu1 %v2125_v1 }
  0xb0   : > { %523 = vmatmul.mubr.f32.gmra.mrb[18].mxu0 %v2432_v36 }
  0xb1   : > { %528 = vmatprep.mubr.f32.mxu0 %v2124_v0  ;;  %1769 = vmatpush1.bf16.msra.mxu0 %v1768_v23 }
  0xb2   : > { %1770 = vmatprep.subr.bf16.mxu0 %v2125_v1  ;;  %1819 = vmatpush1.bf16.msra.mxu1 %v1786_v47 }
  0xb4   : > { %529 = vmatmul.mubr.f32.gmra.mrb[20].mxu0 %v2439_v40 }
  0xb5   : > { %534 = vmatprep.mubr.f32.mxu0 %v2124_v0  ;;  %1772 = vmatpush1.bf16.msra.mxu0 %v1771_v27 }
  0xb6   : > { %1773 = vmatprep.subr.bf16.mxu0 %v2125_v1 }
  0xb8   : > { %535 = vmatmul.mubr.f32.gmra.mrb[22].mxu0 %v2446_v44 }
  0xb9   : > { %540 = vmatprep.mubr.f32.mxu0 %v2124_v0  ;;  %1775 = vmatpush1.bf16.msra.mxu0 %v1774_v31 }
  0xba   : > { %1776 = vmatprep.subr.bf16.mxu0 %v2125_v1 }
  0xbc   : > { %541 = vmatmul.mubr.f32.gmra.mrb[24].mxu0 %v2453_v48 }
  0xbd   : > { %546 = vmatprep.mubr.f32.mxu0 %v2124_v0  ;;  %1778 = vmatpush1.bf16.msra.mxu0 %v1777_v35 }
  0xbe   : > { %1779 = vmatprep.subr.bf16.mxu0 %v2125_v1 }
  0xc0   : > { %547 = vmatmul.mubr.f32.gmra.mrb[26].mxu0 %v2459_v49 }
  0xc1   : > { %552 = vmatprep.mubr.f32.mxu0 %v2124_v0  ;;  %1781 = vmatpush1.bf16.msra.mxu0 %v1780_v39 }
  0xc2   : > { %1782 = vmatprep.subr.bf16.mxu0 %v2125_v1 }
  0xc4   : > { %553 = vmatmul.mubr.f32.gmra.mrb[28].mxu0 %v2465_v50 }
  0xc5   : > { %558 = vmatprep.mubr.f32.mxu0 %v2124_v0  ;;  %1784 = vmatpush1.bf16.msra.mxu0 %v1783_v43 }
  0xc6   : > { %1785 = vmatprep.subr.bf16.mxu0 %v2125_v1  ;;  %v2487_v1 = vld [vmem:[%s2353_s15 + $0x90] sm:$0xff] }
  0xc8   : > { %559 = vmatmul.mubr.f32.gmra.mrb[30].mxu0 %v2471_v51 }
  0xc9   : > { %564 = vmatprep.mubr.f32.mxu0 %v2124_v0  ;;  %1787 = vmatpush1.bf16.msra.mxu0 %v1786_v47 }
  0xcc   : > { %565 = vmatmul.mubr.f32.gmra.mrb[32].mxu0 %v2477_v52 }
  0xcd   : > { %570 = vmatprep.mubr.f32.mxu0 %v2124_v0 }
  0xd0   : > { %571 = vmatmul.mubr.f32.gmra.mrb[34].mxu0 %v2482_v53 }
  0xd1   : > { %576 = vmatprep.mubr.f32.mxu0 %v2124_v0 }
  0xd4   : > { %577 = vmatmul.mubr.f32.gmra.mrb[36].mxu0 %v2487_v1 }
  0xd5   : > { %582 = vmatprep.mubr.f32.mxu0 %v2124_v0 }
  0xd8   : > { %583 = vmatmul.mubr.f32.gmra.mrb[38].mxu0 %v2492_v54 }
  0xd9   : > { %588 = vmatprep.mubr.f32.mxu0 %v2124_v0 }
  0xdc   : > { %589 = vmatmul.mubr.f32.gmra.mrb[40].mxu0 %v2497_v55 }
  0xdd   : > { %594 = vmatprep.mubr.f32.mxu0 %v2124_v0 }
  0xe0   : > { %595 = vmatmul.mubr.f32.gmra.mrb[42].mxu0 %v2502_v56 }
  0xe1   : > { %600 = vmatprep.mubr.f32.mxu0 %v2124_v0 }
  0xe4   : > { %601 = vmatmul.mubr.f32.gmra.mrb[44].mxu0 %v2507_v57 }
  0xe5   : > { %606 = vmatprep.mubr.f32.mxu0 %v2124_v0 }
  0xe8   : > { %607 = vmatmul.mubr.f32.gmra.mrb[46].mxu0 %v2512_v58 }
  0xe9   : > { %612 = vmatprep.mubr.f32.mxu0 %v2124_v0 }
  0xec   : > { %613 = vmatmul.mubr.f32.gmra.mrb[48].mxu0 %v2517_v59 }
  0xed   : > { %618 = vmatprep.mubr.f32.mxu0 %v2124_v0 }
  0xf0   : > { %619 = vmatmul.mubr.f32.gmra.mrb[50].mxu0 %v2522_v60 }
  0xf1   : > { %624 = vmatprep.mubr.f32.mxu0 %v2124_v0 }
  0xf4   : > { %625 = vmatmul.mubr.f32.gmra.mrb[52].mxu0 %v2527_v61 }
  0xf5   : > { %630 = vmatprep.mubr.f32.mxu0 %v2124_v0 }
  0xf8   : > { %631 = vmatmul.mubr.f32.gmra.mrb[54].mxu0 %v2532_v63 }
  0xf9   : > { %636 = vmatprep.mubr.f32.mxu0 %v2124_v0 }
  0xfc   : > { %637 = vmatmul.mubr.f32.gmra.mrb[56].mxu0 %v2537_v2 }
  0xfd   : > { %642 = vmatprep.mubr.f32.mxu0 %v2124_v0 }
 0x100   : > { %643 = vmatmul.mubr.f32.gmra.mrb[58].mxu0 %v2542_v3 }
 0x101   : > { %648 = vmatprep.mubr.f32.mxu0 %v2124_v0 }
 0x104   : > { %649 = vmatmul.mubr.f32.gmra.mrb[60].mxu0 %v2547_v5 }
 0x105   : > { %654 = vmatprep.mubr.f32.mxu0 %v2124_v0 }
 0x108   : > { %655 = vmatmul.mubr.f32.gmra.mrb[62].mxu0 %v2552_v6 }
 0x15f   : > { %v470_v17 = vpop.f32.mrb[0].mxu0 }
 0x160   : > { %v471_v18 = vadd.f32 %v470_v17, %v2558_v14  ;;  %v472_v0 = vpop.f32.mrb[1].mxu0 }
 0x161   : > { %v473_v19 = vadd.f32 %v472_v0, %v2560_v15 }
 0x162   : > { %v661_v23 = vmax.f32 %v471_v18, 0.0 }
 0x163   : > { %v662_v21 = vmax.f32 %v473_v19, 0.0  ;;  %v476_v22 = vpop.f32.mrb[2].mxu0 }
 0x164   : > { %v477_v25 = vadd.f32 %v476_v22, %v2558_v14  ;;  %v478_v26 = vpop.f32.mrb[3].mxu0 }
 0x165   : > { %v479_v27 = vadd.f32 %v478_v26, %v2560_v15  ;;  %821 = vmatprep.mubr.f32.mxu0 %v662_v21 }
 0x166   : > { %822 = vmatmul.mubr.f32.vlgmr.msra.gmra.mrb[64].mxu0 %v661_v23  ;;  %v663_v31 = vmax.f32 %v477_v25, 0.0 }
 0x167   : > { %v664_v29 = vmax.f32 %v479_v27, 0.0  ;;  %v482_v30 = vpop.f32.mrb[4].mxu0 }
 0x168   : > { %v483_v33 = vadd.f32 %v482_v30, %v2558_v14  ;;  %v484_v34 = vpop.f32.mrb[5].mxu0 }
 0x169   : > { %v485_v35 = vadd.f32 %v484_v34, %v2560_v15  ;;  %826 = vmatprep.mubr.f32.mxu0 %v664_v29 }
 0x16a   : > { %v665_v37 = vmax.f32 %v483_v33, 0.0  ;;  %827 = vmatmul.mubr.f32.gmra.mrb[66].mxu0 %v663_v31 }
 0x16b   : > { %v666_v38 = vmax.f32 %v485_v35, 0.0  ;;  %v488_v39 = vpop.f32.mrb[6].mxu0 }
 0x16c   : > { %v489_v41 = vadd.f32 %v488_v39, %v2558_v14  ;;  %v490_v42 = vpop.f32.mrb[7].mxu0 }
 0x16d   : > { %v491_v43 = vadd.f32 %v490_v42, %v2560_v15  ;;  %831 = vmatprep.mubr.f32.mxu0 %v666_v38 }
 0x16e   : > { %v667_v45 = vmax.f32 %v489_v41, 0.0  ;;  %832 = vmatmul.mubr.f32.gmra.mrb[68].mxu0 %v665_v37 }
 0x16f   : > { %v668_v46 = vmax.f32 %v491_v43, 0.0  ;;  %v494_v47 = vpop.f32.mrb[8].mxu0 }
 0x170   : > { %v495_v7 = vadd.f32 %v494_v47, %v2558_v14  ;;  %v496_v9 = vpop.f32.mrb[9].mxu0 }
 0x171   : > { %836 = vmatprep.mubr.f32.mxu0 %v668_v46  ;;  %v497_v10 = vadd.f32 %v496_v9, %v2560_v15 }
 0x172   : > { %v669_v11 = vmax.f32 %v495_v7, 0.0  ;;  %837 = vmatmul.mubr.f32.gmra.mrb[70].mxu0 %v667_v45 }
 0x173   : > { %v500_v13 = vpop.f32.mrb[10].mxu0  ;;  %v670_v17 = vmax.f32 %v497_v10, 0.0 }
 0x174   : > { %v501_v18 = vadd.f32 %v500_v13, %v2558_v14  ;;  %v502_v0 = vpop.f32.mrb[11].mxu0 }
 0x175   : > { %v503_v19 = vadd.f32 %v502_v0, %v2560_v15  ;;  %841 = vmatprep.mubr.f32.mxu1 %v670_v17 }
 0x176   : > { %v671_v21 = vmax.f32 %v501_v18, 0.0  ;;  %842 = vmatmul.mubr.f32.vlgmr.msra.gmra.mrb[0].mxu1 %v669_v11 }
 0x177   : > { %v672_v22 = vmax.f32 %v503_v19, 0.0  ;;  %v506_v23 = vpop.f32.mrb[12].mxu0 }
 0x178   : > { %v507_v25 = vadd.f32 %v506_v23, %v2558_v14  ;;  %v508_v26 = vpop.f32.mrb[13].mxu0 }
 0x179   : > { %v509_v27 = vadd.f32 %v508_v26, %v2560_v15  ;;  %846 = vmatprep.mubr.f32.mxu1 %v672_v22 }
 0x17a   : > { %v673_v29 = vmax.f32 %v507_v25, 0.0  ;;  %847 = vmatmul.mubr.f32.gmra.mrb[2].mxu1 %v671_v21 }
 0x17b   : > { %v674_v30 = vmax.f32 %v509_v27, 0.0  ;;  %v512_v31 = vpop.f32.mrb[14].mxu0 }
 0x17c   : > { %v513_v33 = vadd.f32 %v512_v31, %v2558_v14  ;;  %v514_v34 = vpop.f32.mrb[15].mxu0 }
 0x17d   : > { %v515_v35 = vadd.f32 %v514_v34, %v2560_v15  ;;  %851 = vmatprep.mubr.f32.mxu1 %v674_v30 }
 0x17e   : > { %v675_v37 = vmax.f32 %v513_v33, 0.0  ;;  %852 = vmatmul.mubr.f32.gmra.mrb[4].mxu1 %v673_v29 }
 0x17f   : > { %v676_v38 = vmax.f32 %v515_v35, 0.0  ;;  %v518_v39 = vpop.f32.mrb[16].mxu0 }
 0x180   : > { %v519_v41 = vadd.f32 %v518_v39, %v2558_v14  ;;  %v520_v42 = vpop.f32.mrb[17].mxu0 }
 0x181   : > { %v521_v43 = vadd.f32 %v520_v42, %v2560_v15  ;;  %856 = vmatprep.mubr.f32.mxu1 %v676_v38 }
 0x182   : > { %v677_v45 = vmax.f32 %v519_v41, 0.0  ;;  %857 = vmatmul.mubr.f32.gmra.mrb[6].mxu1 %v675_v37 }
 0x183   : > { %v678_v46 = vmax.f32 %v521_v43, 0.0  ;;  %v524_v47 = vpop.f32.mrb[18].mxu0 }
 0x184   : > { %v525_v7 = vadd.f32 %v524_v47, %v2558_v14  ;;  %v526_v9 = vpop.f32.mrb[19].mxu0 }
 0x185   : > { %v527_v10 = vadd.f32 %v526_v9, %v2560_v15  ;;  %861 = vmatprep.mubr.f32.mxu1 %v678_v46 }
 0x186   : > { %v679_v11 = vmax.f32 %v525_v7, 0.0  ;;  %862 = vmatmul.mubr.f32.gmra.mrb[8].mxu1 %v677_v45 }
 0x187   : > { %v680_v13 = vmax.f32 %v527_v10, 0.0  ;;  %v530_v17 = vpop.f32.mrb[20].mxu0 }
 0x188   : > { %v531_v18 = vadd.f32 %v530_v17, %v2558_v14  ;;  %v532_v0 = vpop.f32.mrb[21].mxu0 }
 0x189   : > { %v533_v19 = vadd.f32 %v532_v0, %v2560_v15  ;;  %866 = vmatprep.mubr.f32.mxu1 %v680_v13 }
 0x18a   : > { %v681_v21 = vmax.f32 %v531_v18, 0.0  ;;  %867 = vmatmul.mubr.f32.gmra.mrb[10].mxu1 %v679_v11 }
 0x18b   : > { %v682_v22 = vmax.f32 %v533_v19, 0.0  ;;  %v536_v23 = vpop.f32.mrb[22].mxu0 }
 0x18c   : > { %v537_v25 = vadd.f32 %v536_v23, %v2558_v14  ;;  %v538_v26 = vpop.f32.mrb[23].mxu0 }
 0x18d   : > { %v539_v27 = vadd.f32 %v538_v26, %v2560_v15  ;;  %871 = vmatprep.mubr.f32.mxu1 %v682_v22 }
 0x18e   : > { %v683_v29 = vmax.f32 %v537_v25, 0.0  ;;  %872 = vmatmul.mubr.f32.gmra.mrb[12].mxu1 %v681_v21 }
 0x18f   : > { %v684_v30 = vmax.f32 %v539_v27, 0.0  ;;  %v542_v31 = vpop.f32.mrb[24].mxu0 }
 0x190   : > { %v543_v33 = vadd.f32 %v542_v31, %v2558_v14  ;;  %v544_v34 = vpop.f32.mrb[25].mxu0 }
 0x191   : > { %v545_v35 = vadd.f32 %v544_v34, %v2560_v15  ;;  %876 = vmatprep.mubr.f32.mxu1 %v684_v30 }
 0x192   : > { %v685_v37 = vmax.f32 %v543_v33, 0.0  ;;  %877 = vmatmul.mubr.f32.gmra.mrb[14].mxu1 %v683_v29 }
 0x193   : > { %v686_v38 = vmax.f32 %v545_v35, 0.0  ;;  %v548_v39 = vpop.f32.mrb[26].mxu0 }
 0x194   : > { %v549_v41 = vadd.f32 %v548_v39, %v2558_v14  ;;  %v550_v42 = vpop.f32.mrb[27].mxu0 }
 0x195   : > { %v551_v43 = vadd.f32 %v550_v42, %v2560_v15  ;;  %881 = vmatprep.mubr.f32.mxu1 %v686_v38 }
 0x196   : > { %v687_v45 = vmax.f32 %v549_v41, 0.0  ;;  %882 = vmatmul.mubr.f32.gmra.mrb[16].mxu1 %v685_v37 }
 0x197   : > { %v688_v46 = vmax.f32 %v551_v43, 0.0  ;;  %v554_v47 = vpop.f32.mrb[28].mxu0 }
 0x198   : > { %v555_v7 = vadd.f32 %v554_v47, %v2558_v14  ;;  %v556_v9 = vpop.f32.mrb[29].mxu0 }
 0x199   : > { %v557_v10 = vadd.f32 %v556_v9, %v2560_v15  ;;  %886 = vmatprep.mubr.f32.mxu1 %v688_v46 }
 0x19a   : > { %v689_v11 = vmax.f32 %v555_v7, 0.0  ;;  %887 = vmatmul.mubr.f32.gmra.mrb[18].mxu1 %v687_v45 }
 0x19b   : > { %v690_v13 = vmax.f32 %v557_v10, 0.0  ;;  %v560_v17 = vpop.f32.mrb[30].mxu0 }
 0x19c   : > { %v561_v18 = vadd.f32 %v560_v17, %v2558_v14  ;;  %v562_v0 = vpop.f32.mrb[31].mxu0 }
 0x19d   : > { %v563_v19 = vadd.f32 %v562_v0, %v2560_v15  ;;  %891 = vmatprep.mubr.f32.mxu1 %v690_v13 }
 0x19e   : > { %v691_v21 = vmax.f32 %v561_v18, 0.0  ;;  %892 = vmatmul.mubr.f32.gmra.mrb[20].mxu1 %v689_v11 }
 0x19f   : > { %v692_v22 = vmax.f32 %v563_v19, 0.0  ;;  %v566_v23 = vpop.f32.mrb[32].mxu0 }
 0x1a0   : > { %v567_v25 = vadd.f32 %v566_v23, %v2558_v14  ;;  %v568_v26 = vpop.f32.mrb[33].mxu0 }
 0x1a1   : > { %v569_v27 = vadd.f32 %v568_v26, %v2560_v15  ;;  %896 = vmatprep.mubr.f32.mxu1 %v692_v22 }
 0x1a2   : > { %v693_v29 = vmax.f32 %v567_v25, 0.0  ;;  %897 = vmatmul.mubr.f32.gmra.mrb[22].mxu1 %v691_v21 }
 0x1a3   : > { %v694_v30 = vmax.f32 %v569_v27, 0.0  ;;  %v572_v31 = vpop.f32.mrb[34].mxu0 }
 0x1a4   : > { %v573_v33 = vadd.f32 %v572_v31, %v2558_v14  ;;  %v574_v34 = vpop.f32.mrb[35].mxu0 }
 0x1a5   : > { %v575_v35 = vadd.f32 %v574_v34, %v2560_v15  ;;  %901 = vmatprep.mubr.f32.mxu1 %v694_v30 }
 0x1a6   : > { %v695_v37 = vmax.f32 %v573_v33, 0.0  ;;  %902 = vmatmul.mubr.f32.gmra.mrb[24].mxu1 %v693_v29 }
 0x1a7   : > { %v696_v38 = vmax.f32 %v575_v35, 0.0  ;;  %v578_v39 = vpop.f32.mrb[36].mxu0 }
 0x1a8   : > { %v579_v41 = vadd.f32 %v578_v39, %v2558_v14  ;;  %v580_v42 = vpop.f32.mrb[37].mxu0 }
 0x1a9   : > { %v581_v43 = vadd.f32 %v580_v42, %v2560_v15  ;;  %906 = vmatprep.mubr.f32.mxu1 %v696_v38 }
 0x1aa   : > { %v697_v45 = vmax.f32 %v579_v41, 0.0  ;;  %907 = vmatmul.mubr.f32.gmra.mrb[26].mxu1 %v695_v37 }
 0x1ab   : > { %v698_v46 = vmax.f32 %v581_v43, 0.0  ;;  %v584_v47 = vpop.f32.mrb[38].mxu0 }
 0x1ac   : > { %v585_v7 = vadd.f32 %v584_v47, %v2558_v14  ;;  %v586_v9 = vpop.f32.mrb[39].mxu0 }
 0x1ad   : > { %v587_v10 = vadd.f32 %v586_v9, %v2560_v15  ;;  %911 = vmatprep.mubr.f32.mxu1 %v698_v46 }
 0x1ae   : > { %v699_v11 = vmax.f32 %v585_v7, 0.0  ;;  %912 = vmatmul.mubr.f32.gmra.mrb[28].mxu1 %v697_v45 }
 0x1af   : > { %v700_v13 = vmax.f32 %v587_v10, 0.0  ;;  %v590_v17 = vpop.f32.mrb[40].mxu0 }
 0x1b0   : > { %v591_v18 = vadd.f32 %v590_v17, %v2558_v14  ;;  %v592_v0 = vpop.f32.mrb[41].mxu0 }
 0x1b1   : > { %v593_v19 = vadd.f32 %v592_v0, %v2560_v15  ;;  %916 = vmatprep.mubr.f32.mxu1 %v700_v13 }
 0x1b2   : > { %v701_v21 = vmax.f32 %v591_v18, 0.0  ;;  %917 = vmatmul.mubr.f32.gmra.mrb[30].mxu1 %v699_v11 }
 0x1b3   : > { %v702_v22 = vmax.f32 %v593_v19, 0.0  ;;  %v596_v23 = vpop.f32.mrb[42].mxu0 }
 0x1b4   : > { %v597_v25 = vadd.f32 %v596_v23, %v2558_v14  ;;  %v598_v26 = vpop.f32.mrb[43].mxu0 }
 0x1b5   : > { %v599_v27 = vadd.f32 %v598_v26, %v2560_v15  ;;  %921 = vmatprep.mubr.f32.mxu1 %v702_v22 }
 0x1b6   : > { %v703_v29 = vmax.f32 %v597_v25, 0.0  ;;  %922 = vmatmul.mubr.f32.gmra.mrb[32].mxu1 %v701_v21 }
 0x1b7   : > { %v704_v30 = vmax.f32 %v599_v27, 0.0  ;;  %v602_v31 = vpop.f32.mrb[44].mxu0 }
 0x1b8   : > { %v603_v33 = vadd.f32 %v602_v31, %v2558_v14  ;;  %v604_v34 = vpop.f32.mrb[45].mxu0 }
 0x1b9   : > { %v605_v35 = vadd.f32 %v604_v34, %v2560_v15  ;;  %926 = vmatprep.mubr.f32.mxu1 %v704_v30 }
 0x1ba   : > { %v705_v37 = vmax.f32 %v603_v33, 0.0  ;;  %927 = vmatmul.mubr.f32.gmra.mrb[34].mxu1 %v703_v29 }
 0x1bb   : > { %v706_v38 = vmax.f32 %v605_v35, 0.0  ;;  %v608_v39 = vpop.f32.mrb[46].mxu0 }
 0x1bc   : > { %v609_v41 = vadd.f32 %v608_v39, %v2558_v14  ;;  %v610_v42 = vpop.f32.mrb[47].mxu0 }
 0x1bd   : > { %v611_v43 = vadd.f32 %v610_v42, %v2560_v15  ;;  %931 = vmatprep.mubr.f32.mxu1 %v706_v38 }
 0x1be   : > { %v707_v45 = vmax.f32 %v609_v41, 0.0  ;;  %932 = vmatmul.mubr.f32.gmra.mrb[36].mxu1 %v705_v37 }
 0x1bf   : > { %v708_v46 = vmax.f32 %v611_v43, 0.0  ;;  %v614_v47 = vpop.f32.mrb[48].mxu0 }
 0x1c0   : > { %v615_v7 = vadd.f32 %v614_v47, %v2558_v14  ;;  %v616_v9 = vpop.f32.mrb[49].mxu0 }
 0x1c1   : > { %v617_v10 = vadd.f32 %v616_v9, %v2560_v15  ;;  %936 = vmatprep.mubr.f32.mxu1 %v708_v46 }
 0x1c2   : > { %v709_v11 = vmax.f32 %v615_v7, 0.0  ;;  %937 = vmatmul.mubr.f32.gmra.mrb[38].mxu1 %v707_v45 }
 0x1c3   : > { %v710_v13 = vmax.f32 %v617_v10, 0.0  ;;  %v620_v17 = vpop.f32.mrb[50].mxu0 }
 0x1c4   : > { %v621_v18 = vadd.f32 %v620_v17, %v2558_v14  ;;  %v622_v0 = vpop.f32.mrb[51].mxu0 }
 0x1c5   : > { %v623_v19 = vadd.f32 %v622_v0, %v2560_v15  ;;  %941 = vmatprep.mubr.f32.mxu1 %v710_v13 }
 0x1c6   : > { %v711_v21 = vmax.f32 %v621_v18, 0.0  ;;  %942 = vmatmul.mubr.f32.gmra.mrb[40].mxu1 %v709_v11 }
 0x1c7   : > { %v712_v22 = vmax.f32 %v623_v19, 0.0  ;;  %v626_v23 = vpop.f32.mrb[52].mxu0 }
 0x1c8   : > { %v627_v25 = vadd.f32 %v626_v23, %v2558_v14  ;;  %v628_v26 = vpop.f32.mrb[53].mxu0 }
 0x1c9   : > { %v629_v27 = vadd.f32 %v628_v26, %v2560_v15  ;;  %946 = vmatprep.mubr.f32.mxu1 %v712_v22 }
 0x1ca   : > { %v713_v29 = vmax.f32 %v627_v25, 0.0  ;;  %947 = vmatmul.mubr.f32.gmra.mrb[42].mxu1 %v711_v21 }
 0x1cb   : > { %v714_v30 = vmax.f32 %v629_v27, 0.0  ;;  %v632_v31 = vpop.f32.mrb[54].mxu0 }
 0x1cc   : > { %v633_v33 = vadd.f32 %v632_v31, %v2558_v14  ;;  %v634_v34 = vpop.f32.mrb[55].mxu0 }
 0x1cd   : > { %v635_v35 = vadd.f32 %v634_v34, %v2560_v15  ;;  %951 = vmatprep.mubr.f32.mxu1 %v714_v30 }
 0x1ce   : > { %v715_v37 = vmax.f32 %v633_v33, 0.0  ;;  %952 = vmatmul.mubr.f32.gmra.mrb[44].mxu1 %v713_v29  ;;  %v2629_v33 = vld [vmem:[%s3182_s4] ss:$0 sm:$0xff] }
 0x1cf   : > { %v716_v38 = vmax.f32 %v635_v35, 0.0  ;;  %v638_v39 = vpop.f32.mrb[56].mxu0 }
 0x1d0   : > { %v639_v41 = vadd.f32 %v638_v39, %v2558_v14  ;;  %v640_v42 = vpop.f32.mrb[57].mxu0 }
 0x1d1   : > { %v641_v43 = vadd.f32 %v640_v42, %v2560_v15  ;;  %956 = vmatprep.mubr.f32.mxu1 %v716_v38 }
 0x1d2   : > { %v717_v45 = vmax.f32 %v639_v41, 0.0  ;;  %957 = vmatmul.mubr.f32.gmra.mrb[46].mxu1 %v715_v37 }
 0x1d3   : > { %v718_v46 = vmax.f32 %v641_v43, 0.0  ;;  %v644_v47 = vpop.f32.mrb[58].mxu0 }
 0x1d4   : > { %v645_v7 = vadd.f32 %v644_v47, %v2558_v14  ;;  %v646_v9 = vpop.f32.mrb[59].mxu0 }
 0x1d5   : > { %v647_v10 = vadd.f32 %v646_v9, %v2560_v15  ;;  %961 = vmatprep.mubr.f32.mxu1 %v718_v46 }
 0x1d6   : > { %v719_v11 = vmax.f32 %v645_v7, 0.0  ;;  %962 = vmatmul.mubr.f32.gmra.mrb[48].mxu1 %v717_v45 }
 0x1d7   : > { %v720_v13 = vmax.f32 %v647_v10, 0.0  ;;  %v650_v17 = vpop.f32.mrb[60].mxu0 }
 0x1d8   : > { %v651_v18 = vadd.f32 %v650_v17, %v2558_v14  ;;  %v652_v0 = vpop.f32.mrb[61].mxu0 }
 0x1d9   : > { %v653_v19 = vadd.f32 %v652_v0, %v2560_v15  ;;  %966 = vmatprep.mubr.f32.mxu1 %v720_v13 }
 0x1da   : > { %v721_v21 = vmax.f32 %v651_v18, 0.0  ;;  %967 = vmatmul.mubr.f32.gmra.mrb[50].mxu1 %v719_v11 }
 0x1db   : > { %v722_v22 = vmax.f32 %v653_v19, 0.0  ;;  %v656_v23 = vpop.f32.mrb[62].mxu0 }
 0x1dc   : > { %v657_v25 = vadd.f32 %v656_v23, %v2558_v14  ;;  %v658_v26 = vpop.f32.mrb[63].mxu0 }
 0x1dd   : > { %v659_v27 = vadd.f32 %v658_v26, %v2560_v15  ;;  %971 = vmatprep.mubr.f32.mxu1 %v722_v22 }
 0x1de   : > { %v723_v29 = vmax.f32 %v657_v25, 0.0  ;;  %972 = vmatmul.mubr.f32.gmra.mrb[52].mxu1 %v721_v21 }
 0x1df   : > { %v724_v30 = vmax.f32 %v659_v27, 0.0 }
 0x1e1   : > { %976 = vmatprep.mubr.f32.mxu1 %v724_v30 }
 0x1e2   : > { %977 = vmatmul.mubr.f32.gmra.mrb[54].mxu1 %v723_v29 }
 0x239   : > { %v823_v31 = vpop.f32.mrb[64].mxu0 }
 0x23a   : > { %v982_v34 = vadd.f32 %v823_v31, %v2369_v62  ;;  %v825_v35 = vpop.f32.mrb[65].mxu0 }
 0x23c   : > { %v2633_v14 = vadd.f32 %v2629_v33, %v982_v34 }
 0x23d   : > { %v828_v37 = vpop.f32.mrb[66].mxu0 }
 0x23e   : > { %v983_v15 = vadd.f32 %v828_v37, %v2376_v4  ;;  %1053 = vadd.xlane.f32.xlu0 %v2633_v14  ;;  %v830_v38 = vpop.f32.mrb[67].mxu0  ;;  %v1149_v41 = vmul.f32 %v2633_v14, %v2633_v14 }
 0x240   : > { %v2638_v39 = vadd.f32 %v2629_v33, %v983_v15 }
 0x241   : > { %v833_v42 = vpop.f32.mrb[68].mxu0 }
 0x242   : > { %v984_v43 = vadd.f32 %v833_v42, %v2383_v8  ;;  %1181 = vadd.xlane.f32.xlu0 %v1149_v41  ;;  %v835_v62 = vpop.f32.mrb[69].mxu0  ;;  %v1150_v45 = vmul.f32 %v2638_v39, %v2638_v39 }
 0x244   : > { %v2646_v46 = vadd.f32 %v2629_v33, %v984_v43  ;;  %1183 = vadd.xlane.f32.xlu1 %v1150_v45 }
 0x245   : > { %v838_v4 = vpop.f32.mrb[70].mxu0 }
 0x246   : > { %v985_v47 = vadd.f32 %v838_v4, %v2390_v12  ;;  %1055 = vadd.xlane.f32.xlu0 %v2638_v39  ;;  %v840_v7 = vpop.f32.mrb[71].mxu0  ;;  %v1151_v8 = vmul.f32 %v2646_v46, %v2646_v46 }
 0x248   : > { %1057 = vadd.xlane.f32.xlu1 %v2646_v46  ;;  %v2654_v10 = vadd.f32 %v2629_v33, %v985_v47 }
 0x249   : > { %v843_v9 = vpop.f32.mrb[0].mxu1 }
 0x24a   : > { %v986_v11 = vadd.f32 %v843_v9, %v2397_v16  ;;  %v845_v13 = vpop.f32.mrb[1].mxu1  ;;  %1185 = vadd.xlane.f32.xlu0 %v1151_v8  ;;  %v1152_v19 = vmul.f32 %v2654_v10, %v2654_v10 }
 0x24c   : > { %v2658_v17 = vadd.f32 %v2629_v33, %v986_v11  ;;  %1059 = vadd.xlane.f32.xlu1 %v2654_v10 }
 0x24d   : > { %v848_v12 = vpop.f32.mrb[2].mxu1 }
 0x24e   : > { %v987_v18 = vadd.f32 %v848_v12, %v2404_v20  ;;  %v850_v0 = vpop.f32.mrb[3].mxu1  ;;  %1061 = vadd.xlane.f32.xlu0 %v2658_v17  ;;  %v1153_v16 = vmul.f32 %v2658_v17, %v2658_v17 }
 0x250   : > { %1187 = vadd.xlane.f32.xlu1 %v1152_v19  ;;  %v2668_v22 = vadd.f32 %v2629_v33, %v987_v18 }
 0x251   : > { %v853_v21 = vpop.f32.mrb[4].mxu1 }
 0x252   : > { %v988_v23 = vadd.f32 %v853_v21, %v2411_v24  ;;  %v855_v25 = vpop.f32.mrb[5].mxu1  ;;  %1189 = vadd.xlane.f32.xlu0 %v1153_v16  ;;  %v1154_v30 = vmul.f32 %v2668_v22, %v2668_v22 }
 0x254   : > { %v2672_v20 = vadd.f32 %v2629_v33, %v988_v23  ;;  %1063 = vadd.xlane.f32.xlu1 %v2668_v22 }
 0x255   : > { %v858_v26 = vpop.f32.mrb[6].mxu1 }
 0x256   : > { %v989_v27 = vadd.f32 %v858_v26, %v2418_v28  ;;  %v860_v29 = vpop.f32.mrb[7].mxu1  ;;  %1065 = vadd.xlane.f32.xlu0 %v2672_v20  ;;  %v1155_v24 = vmul.f32 %v2672_v20, %v2672_v20 }
 0x258   : > { %1191 = vadd.xlane.f32.xlu1 %v1154_v30  ;;  %v2682_v34 = vadd.f32 %v2629_v33, %v989_v27 }
 0x259   : > { %v863_v31 = vpop.f32.mrb[8].mxu1 }
 0x25a   : > { %v990_v35 = vadd.f32 %v863_v31, %v2425_v32  ;;  %v865_v37 = vpop.f32.mrb[9].mxu1  ;;  %1193 = vadd.xlane.f32.xlu0 %v1155_v24  ;;  %v1156_v42 = vmul.f32 %v2682_v34, %v2682_v34 }
 0x25c   : > { %v2686_v28 = vadd.f32 %v2629_v33, %v990_v35  ;;  %1067 = vadd.xlane.f32.xlu1 %v2682_v34 }
 0x25d   : > { %v868_v15 = vpop.f32.mrb[10].mxu1 }
 0x25e   : > { %v991_v38 = vadd.f32 %v868_v15, %v2432_v36  ;;  %v870_v41 = vpop.f32.mrb[11].mxu1  ;;  %1069 = vadd.xlane.f32.xlu0 %v2686_v28  ;;  %v1157_v32 = vmul.f32 %v2686_v28, %v2686_v28 }
 0x260   : > { %1195 = vadd.xlane.f32.xlu1 %v1156_v42  ;;  %v2696_v62 = vadd.f32 %v2629_v33, %v991_v38 }
 0x261   : > { %v873_v43 = vpop.f32.mrb[12].mxu1 }
 0x262   : > { %v992_v45 = vadd.f32 %v873_v43, %v2439_v40  ;;  %v875_v4 = vpop.f32.mrb[13].mxu1  ;;  %1197 = vadd.xlane.f32.xlu0 %v1157_v32  ;;  %v1158_v9 = vmul.f32 %v2696_v62, %v2696_v62 }
 0x264   : > { %v2700_v36 = vadd.f32 %v2629_v33, %v992_v45  ;;  %1071 = vadd.xlane.f32.xlu1 %v2696_v62 }
 0x265   : > { %v878_v47 = vpop.f32.mrb[14].mxu1 }
 0x266   : > { %v993_v7 = vadd.f32 %v878_v47, %v2446_v44  ;;  %v880_v8 = vpop.f32.mrb[15].mxu1  ;;  %1073 = vadd.xlane.f32.xlu0 %v2700_v36  ;;  %v1159_v40 = vmul.f32 %v2700_v36, %v2700_v36 }
 0x268   : > { %1199 = vadd.xlane.f32.xlu1 %v1158_v9  ;;  %v2710_v13 = vadd.f32 %v2629_v33, %v993_v7 }
 0x269   : > { %v883_v11 = vpop.f32.mrb[16].mxu1 }
 0x26a   : > { %v994_v12 = vadd.f32 %v883_v11, %v2453_v48  ;;  %v885_v18 = vpop.f32.mrb[17].mxu1  ;;  %1201 = vadd.xlane.f32.xlu0 %v1159_v40  ;;  %v1160_v21 = vmul.f32 %v2710_v13, %v2710_v13 }
 0x26c   : > { %v2714_v44 = vadd.f32 %v2629_v33, %v994_v12  ;;  %1075 = vadd.xlane.f32.xlu1 %v2710_v13 }
 0x26d   : > { %v888_v0 = vpop.f32.mrb[18].mxu1 }
 0x26e   : > { %v995_v19 = vadd.f32 %v888_v0, %v2459_v49  ;;  %v890_v16 = vpop.f32.mrb[19].mxu1  ;;  %1077 = vadd.xlane.f32.xlu0 %v2714_v44  ;;  %v1161_v48 = vmul.f32 %v2714_v44, %v2714_v44 }
 0x270   : > { %1203 = vadd.xlane.f32.xlu1 %v1160_v21  ;;  %v2724_v25 = vadd.f32 %v2629_v33, %v995_v19 }
 0x271   : > { %v893_v23 = vpop.f32.mrb[20].mxu1 }
 0x272   : > { %v996_v26 = vadd.f32 %v893_v23, %v2465_v50  ;;  %v895_v27 = vpop.f32.mrb[21].mxu1  ;;  %1205 = vadd.xlane.f32.xlu0 %v1161_v48  ;;  %v1162_v31 = vmul.f32 %v2724_v25, %v2724_v25 }
 0x274   : > { %v2728_v49 = vadd.f32 %v2629_v33, %v996_v26  ;;  %1079 = vadd.xlane.f32.xlu1 %v2724_v25 }
 0x275   : > { %v898_v29 = vpop.f32.mrb[22].mxu1 }
 0x276   : > { %v997_v30 = vadd.f32 %v898_v29, %v2471_v51  ;;  %v900_v24 = vpop.f32.mrb[23].mxu1  ;;  %1081 = vadd.xlane.f32.xlu0 %v2728_v49  ;;  %v1163_v50 = vmul.f32 %v2728_v49, %v2728_v49 }
 0x278   : > { %1207 = vadd.xlane.f32.xlu1 %v1162_v31  ;;  %v2738_v37 = vadd.f32 %v2629_v33, %v997_v30 }
 0x279   : > { %v903_v35 = vpop.f32.mrb[24].mxu1 }
 0x27a   : > { %v998_v15 = vadd.f32 %v903_v35, %v2477_v52  ;;  %v905_v38 = vpop.f32.mrb[25].mxu1  ;;  %1209 = vadd.xlane.f32.xlu0 %v1163_v50  ;;  %v1164_v43 = vmul.f32 %v2738_v37, %v2738_v37 }
 0x27c   : > { %v2742_v51 = vadd.f32 %v2629_v33, %v998_v15  ;;  %1083 = vadd.xlane.f32.xlu1 %v2738_v37 }
 0x27d   : > { %v908_v41 = vpop.f32.mrb[26].mxu1 }
 0x27e   : > { %v999_v42 = vadd.f32 %v908_v41, %v2482_v53  ;;  %v910_v32 = vpop.f32.mrb[27].mxu1  ;;  %1085 = vadd.xlane.f32.xlu0 %v2742_v51  ;;  %v1165_v52 = vmul.f32 %v2742_v51, %v2742_v51 }
 0x280   : > { %1211 = vadd.xlane.f32.xlu1 %v1164_v43  ;;  %v2752_v4 = vadd.f32 %v2629_v33, %v999_v42 }
 0x281   : > { %v913_v45 = vpop.f32.mrb[28].mxu1 }
 0x282   : > { %v1000_v47 = vadd.f32 %v913_v45, %v2487_v1  ;;  %v915_v7 = vpop.f32.mrb[29].mxu1  ;;  %1213 = vadd.xlane.f32.xlu0 %v1165_v52  ;;  %v1166_v11 = vmul.f32 %v2752_v4, %v2752_v4 }
 0x284   : > { %v2756_v53 = vadd.f32 %v2629_v33, %v1000_v47  ;;  %1087 = vadd.xlane.f32.xlu1 %v2752_v4 }
 0x285   : > { %v918_v8 = vpop.f32.mrb[30].mxu1 }
 0x286   : > { %v1001_v9 = vadd.f32 %v918_v8, %v2492_v54  ;;  %v920_v40 = vpop.f32.mrb[31].mxu1  ;;  %1089 = vadd.xlane.f32.xlu0 %v2756_v53  ;;  %v1167_v1 = vmul.f32 %v2756_v53, %v2756_v53 }
 0x288   : > { %1215 = vadd.xlane.f32.xlu1 %v1166_v11  ;;  %v2766_v18 = vadd.f32 %v2629_v33, %v1001_v9 }
 0x289   : > { %v923_v12 = vpop.f32.mrb[32].mxu1 }
 0x28a   : > { %v1002_v0 = vadd.f32 %v923_v12, %v2497_v55  ;;  %v925_v19 = vpop.f32.mrb[33].mxu1  ;;  %1217 = vadd.xlane.f32.xlu0 %v1167_v1  ;;  %v1168_v23 = vmul.f32 %v2766_v18, %v2766_v18 }
 0x28c   : > { %v2770_v54 = vadd.f32 %v2629_v33, %v1002_v0  ;;  %1091 = vadd.xlane.f32.xlu1 %v2766_v18 }
 0x28d   : > { %v928_v16 = vpop.f32.mrb[34].mxu1 }
 0x28e   : > { %v1003_v21 = vadd.f32 %v928_v16, %v2502_v56  ;;  %v930_v48 = vpop.f32.mrb[35].mxu1  ;;  %1093 = vadd.xlane.f32.xlu0 %v2770_v54  ;;  %v1169_v55 = vmul.f32 %v2770_v54, %v2770_v54 }
 0x290   : > { %1219 = vadd.xlane.f32.xlu1 %v1168_v23  ;;  %v2780_v27 = vadd.f32 %v2629_v33, %v1003_v21 }
 0x291   : > { %v933_v26 = vpop.f32.mrb[36].mxu1 }
 0x292   : > { %v1004_v29 = vadd.f32 %v933_v26, %v2507_v57  ;;  %v935_v30 = vpop.f32.mrb[37].mxu1  ;;  %1221 = vadd.xlane.f32.xlu0 %v1169_v55  ;;  %v1170_v35 = vmul.f32 %v2780_v27, %v2780_v27 }
 0x294   : > { %v2784_v56 = vadd.f32 %v2629_v33, %v1004_v29  ;;  %1095 = vadd.xlane.f32.xlu1 %v2780_v27 }
 0x295   : > { %v938_v24 = vpop.f32.mrb[38].mxu1 }
 0x296   : > { %v1005_v31 = vadd.f32 %v938_v24, %v2512_v58  ;;  %v940_v50 = vpop.f32.mrb[39].mxu1  ;;  %1097 = vadd.xlane.f32.xlu0 %v2784_v56  ;;  %v1171_v57 = vmul.f32 %v2784_v56, %v2784_v56 }
 0x298   : > { %1223 = vadd.xlane.f32.xlu1 %v1170_v35  ;;  %v2794_v38 = vadd.f32 %v2629_v33, %v1005_v31 }
 0x299   : > { %v943_v15 = vpop.f32.mrb[40].mxu1 }
 0x29a   : > { %v1006_v41 = vadd.f32 %v943_v15, %v2517_v59  ;;  %v945_v42 = vpop.f32.mrb[41].mxu1  ;;  %1225 = vadd.xlane.f32.xlu0 %v1171_v57  ;;  %v1172_v45 = vmul.f32 %v2794_v38, %v2794_v38 }
 0x29c   : > { %v2798_v58 = vadd.f32 %v2629_v33, %v1006_v41  ;;  %1099 = vadd.xlane.f32.xlu1 %v2794_v38 }
 0x29d   : > { %v948_v32 = vpop.f32.mrb[42].mxu1 }
 0x29e   : > { %v1007_v43 = vadd.f32 %v948_v32, %v2522_v60  ;;  %v950_v52 = vpop.f32.mrb[43].mxu1  ;;  %1101 = vadd.xlane.f32.xlu0 %v2798_v58  ;;  %v1173_v59 = vmul.f32 %v2798_v58, %v2798_v58 }
 0x2a0   : > { %1227 = vadd.xlane.f32.xlu1 %v1172_v45  ;;  %v2808_v7 = vadd.f32 %v2629_v33, %v1007_v43 }
 0x2a1   : > { %v953_v47 = vpop.f32.mrb[44].mxu1 }
 0x2a2   : > { %v1008_v8 = vadd.f32 %v953_v47, %v2527_v61  ;;  %v955_v9 = vpop.f32.mrb[45].mxu1  ;;  %1229 = vadd.xlane.f32.xlu0 %v1173_v59  ;;  %v1174_v12 = vmul.f32 %v2808_v7, %v2808_v7 }
 0x2a4   : > { %v2812_v60 = vadd.f32 %v2629_v33, %v1008_v8  ;;  %1103 = vadd.xlane.f32.xlu1 %v2808_v7 }
 0x2a5   : > { %v958_v40 = vpop.f32.mrb[46].mxu1 }
 0x2a6   : > { %v1009_v11 = vadd.f32 %v958_v40, %v2532_v63  ;;  %v960_v1 = vpop.f32.mrb[47].mxu1  ;;  %1105 = vadd.xlane.f32.xlu0 %v2812_v60  ;;  %v1175_v61 = vmul.f32 %v2812_v60, %v2812_v60 }
 0x2a8   : > { %1231 = vadd.xlane.f32.xlu1 %v1174_v12  ;;  %v2822_v19 = vadd.f32 %v2629_v33, %v1009_v11 }
 0x2a9   : > { %v963_v0 = vpop.f32.mrb[48].mxu1 }
 0x2aa   : > { %v1010_v16 = vadd.f32 %v963_v0, %v2537_v2  ;;  %v965_v21 = vpop.f32.mrb[49].mxu1  ;;  %1233 = vadd.xlane.f32.xlu0 %v1175_v61  ;;  %v1176_v26 = vmul.f32 %v2822_v19, %v2822_v19 }
 0x2ac   : > { %v2826_v63 = vadd.f32 %v2629_v33, %v1010_v16  ;;  %1107 = vadd.xlane.f32.xlu1 %v2822_v19 }
 0x2ad   : > { %v968_v48 = vpop.f32.mrb[50].mxu1 }
 0x2ae   : > { %v1011_v23 = vadd.f32 %v968_v48, %v2542_v3  ;;  %v970_v55 = vpop.f32.mrb[51].mxu1  ;;  %1109 = vadd.xlane.f32.xlu0 %v2826_v63  ;;  %v1177_v2 = vmul.f32 %v2826_v63, %v2826_v63 }
 0x2b0   : > { %1235 = vadd.xlane.f32.xlu1 %v1176_v26  ;;  %v2836_v30 = vadd.f32 %v2629_v33, %v1011_v23 }
 0x2b1   : > { %v973_v29 = vpop.f32.mrb[52].mxu1 }
 0x2b2   : > { %v1012_v24 = vadd.f32 %v973_v29, %v2547_v5  ;;  %v975_v31 = vpop.f32.mrb[53].mxu1  ;;  %1237 = vadd.xlane.f32.xlu0 %v1177_v2  ;;  %v1178_v15 = vmul.f32 %v2836_v30, %v2836_v30 }
 0x2b4   : > { %v2840_v3 = vadd.f32 %v2629_v33, %v1012_v24  ;;  %1111 = vadd.xlane.f32.xlu1 %v2836_v30 }
 0x2b5   : > { %v978_v50 = vpop.f32.mrb[54].mxu1 }
 0x2b6   : > { %v1013_v35 = vadd.f32 %v978_v50, %v2552_v6  ;;  %v980_v57 = vpop.f32.mrb[55].mxu1  ;;  %1113 = vadd.xlane.f32.xlu0 %v2840_v3  ;;  %v1179_v5 = vmul.f32 %v2840_v3, %v2840_v3 }
 0x2b8   : > { %1239 = vadd.xlane.f32.xlu1 %v1178_v15  ;;  %v2850_v41 = vadd.f32 %v2629_v33, %v1013_v35 }
 0x2ba   : > { %1241 = vadd.xlane.f32.xlu0 %v1179_v5  ;;  %v1180_v42 = vmul.f32 %v2850_v41, %v2850_v41 }
 0x2bc   : > { %1115 = vadd.xlane.f32.xlu1 %v2850_v41 }
 0x2c0   : > { %1243 = vadd.xlane.f32.xlu1 %v1180_v42  ;;  %v2865_v42 = vld [vmem:[%s3183_s5] ss:$0 sm:$0xff] }
 0x2cb   : > { %v1054_v6 = vpop.xlane.xlu0 %1053 }
 0x2cc   : > { %v1117_v32 = vmul.f32 0.0078125, %v1054_v6 }
 0x2ce   : > { %v1277_v52 = vmul.f32 %v1117_v32, %v1117_v32  ;;  %v1405_v57 = vsub.f32 %v2633_v14, %v1117_v32 }
 0x2cf   : > { %v1182_v43 = vpop.xlane.xlu0 %1181 }
 0x2d0   : > { %v1245_v45 = vmul.f32 0.0078125, %v1182_v43 }
 0x2d1   : > { %v1184_v59 = vpop.xlane.xlu1 %1183 }
 0x2d2   : > { %v1309_v47 = vsub.f32 %v1245_v45, %v1277_v52  ;;  %v1246_v33 = vmul.f32 0.0078125, %v1184_v59 }
 0x2d3   : > { %v1056_v8 = vpop.xlane.xlu0 %1055 }
 0x2d4   : > { %v1341_v9 = vadd.f32 1e-05, %v1309_v47  ;;  %v1118_v40 = vmul.f32 0.0078125, %v1056_v8  ;;  %v2872_v47 = vld [vmem:[%s3184_s6] ss:$0 sm:$0xff] }
 0x2d5   : > { %v1058_v11 = vpop.xlane.xlu1 %1057 }
 0x2d6   : > { %1895 = vrsqrt.f32 %v1341_v9  ;;  %v1278_v1 = vmul.f32 %v1118_v40, %v1118_v40  ;;  %v1119_v12 = vmul.f32 0.0078125, %v1058_v11 }
 0x2d7   : > { %v1186_v61 = vpop.xlane.xlu0 %1185 }
 0x2d8   : > { %v1310_v0 = vsub.f32 %v1246_v33, %v1278_v1  ;;  %v1279_v16 = vmul.f32 %v1119_v12, %v1119_v12  ;;  %v1247_v21 = vmul.f32 0.0078125, %v1186_v61  ;;  %v1406_v61 = vsub.f32 %v2638_v39, %v1118_v40 }
 0x2d9   : > { %v1060_v48 = vpop.xlane.xlu1 %1059 }
 0x2da   : > { %v1342_v23 = vadd.f32 1e-05, %v1310_v0  ;;  %v1311_v55 = vsub.f32 %v1247_v21, %v1279_v16  ;;  %v2855_v26 = vmul.f32 0.0078125, %v1060_v48 }
 0x2db   : > { %v1062_v2 = vpop.xlane.xlu0 %1061 }
 0x2dc   : > { %1897 = vrsqrt.f32 %v1342_v23  ;;  %v1343_v29 = vadd.f32 1e-05, %v1311_v55  ;;  %v2857_v24 = vmul.f32 0.0078125, %v1062_v2  ;;  %v1280_v50 = vmul.f32 %v2855_v26, %v2855_v26 }
 0x2dd   : > { %v1188_v31 = vpop.xlane.xlu1 %1187  ;;  %v1407_v2 = vsub.f32 %v2646_v46, %v1119_v12 }
 0x2de   : > { %1899 = vrsqrt.f32 %v1343_v29  ;;  %v1248_v35 = vmul.f32 0.0078125, %v1188_v31  ;;  %v1281_v6 = vmul.f32 %v2857_v24, %v2857_v24 }
 0x2df   : > { %v1190_v15 = vpop.xlane.xlu0 %1189 }
 0x2e0   : > { %v1896_v5 = vpop.eup %1895  ;;  %v1312_v43 = vsub.f32 %v1248_v35, %v1280_v50  ;;  %v1249_v52 = vmul.f32 0.0078125, %v1190_v15 }
 0x2e1   : > { %v1437_v45 = vmul.f32 %v1896_v5, %v1405_v57  ;;  %v1064_v59 = vpop.xlane.xlu1 %1063 }
 0x2e2   : > { %v1344_v14 = vadd.f32 1e-05, %v1312_v43  ;;  %v1313_v32 = vsub.f32 %v1249_v52, %v1281_v6  ;;  %v2874_v8 = vmul.f32 0.0078125, %v1064_v59 }
 0x2e3   : > { %v1476_v9 = vmul.f32 %v2865_v42, %v1437_v45  ;;  %v1066_v11 = vpop.xlane.xlu0 %1065 }
 0x2e4   : > { %1901 = vrsqrt.f32 %v1344_v14  ;;  %v1345_v33 = vadd.f32 1e-05, %v1313_v32  ;;  %v2879_v0 = vmul.f32 0.0078125, %v1066_v11  ;;  %v1282_v48 = vmul.f32 %v2874_v8, %v2874_v8 }
 0x2e5   : > { %v1515_v1 = vadd.f32 %v2872_v47, %v1476_v9  ;;  %v1192_v16 = vpop.xlane.xlu1 %1191  ;;  %v1408_v14 = vsub.f32 %v2654_v10, %v2855_v26 }
 0x2e6   : > { %v1898_v21 = vpop.eup %1897  ;;  %1903 = vrsqrt.f32 %v1345_v33  ;;  %v1250_v23 = vmul.f32 0.0078125, %v1192_v16  ;;  %v1283_v40 = vmul.f32 %v2879_v0, %v2879_v0 }
 0x2e7   : > { %1547 = vst [vmem:[%s2885_s21] sm:$0xff] %v1515_v1  ;;  %v1438_v55 = vmul.f32 %v1898_v21, %v1406_v61  ;;  %v1194_v29 = vpop.xlane.xlu0 %1193  ;;  %v1409_v61 = vsub.f32 %v2658_v17, %v2857_v24 }
 0x2e8   : > { %v1900_v39 = vpop.eup %1899  ;;  %v1314_v31 = vsub.f32 %v1250_v23, %v1282_v48  ;;  %v1251_v50 = vmul.f32 0.0078125, %v1194_v29 }
 0x2e9   : > { %v1477_v35 = vmul.f32 %v2865_v42, %v1438_v55  ;;  %v1439_v57 = vmul.f32 %v1900_v39, %v1407_v2  ;;  %v1068_v15 = vpop.xlane.xlu1 %1067 }
 0x2ea   : > { %v1346_v5 = vadd.f32 1e-05, %v1314_v31  ;;  %v1315_v6 = vsub.f32 %v1251_v50, %v1283_v40  ;;  %v2892_v43 = vmul.f32 0.0078125, %v1068_v15  ;;  %v1410_v15 = vsub.f32 %v2668_v22, %v2874_v8 }
 0x2eb   : > { %v1516_v52 = vadd.f32 %v2872_v47, %v1477_v35  ;;  %v1478_v46 = vmul.f32 %v2865_v42, %v1439_v57  ;;  %v1070_v12 = vpop.xlane.xlu0 %1069 }
 0x2ec   : > { %1905 = vrsqrt.f32 %v1346_v5  ;;  %v1347_v45 = vadd.f32 1e-05, %v1315_v6  ;;  %v2900_v32 = vmul.f32 0.0078125, %v1070_v12  ;;  %v1284_v33 = vmul.f32 %v2892_v43, %v2892_v43 }
 0x2ed   : > { %1548 = vst [vmem:[%s2885_s21 + $0x8] sm:$0xff] %v1516_v52  ;;  %v1517_v59 = vadd.f32 %v2872_v47, %v1478_v46  ;;  %v1196_v9 = vpop.xlane.xlu1 %1195 }
 0x2ee   : > { %v1902_v11 = vpop.eup %1901  ;;  %1907 = vrsqrt.f32 %v1347_v45  ;;  %v1252_v1 = vmul.f32 0.0078125, %v1196_v9  ;;  %v1285_v10 = vmul.f32 %v2900_v32, %v2900_v32  ;;  %v1411_v45 = vsub.f32 %v2672_v20, %v2879_v0 }
 0x2ef   : > { %1549 = vst [vmem:[%s2885_s21 + $0x10] sm:$0xff] %v1517_v59  ;;  %v1440_v16 = vmul.f32 %v1902_v11, %v1408_v14  ;;  %v1198_v21 = vpop.xlane.xlu0 %1197 }
 0x2f0   : > { %v1904_v48 = vpop.eup %1903  ;;  %v1316_v26 = vsub.f32 %v1252_v1, %v1284_v33  ;;  %v1253_v23 = vmul.f32 0.0078125, %v1198_v21 }
 0x2f1   : > { %v1479_v55 = vmul.f32 %v2865_v42, %v1440_v16  ;;  %v1441_v2 = vmul.f32 %v1904_v48, %v1409_v61  ;;  %v1072_v29 = vpop.xlane.xlu1 %1071 }
 0x2f2   : > { %v1348_v39 = vadd.f32 1e-05, %v1316_v26  ;;  %v1317_v40 = vsub.f32 %v1253_v23, %v1285_v10  ;;  %v2910_v31 = vmul.f32 0.0078125, %v1072_v29 }
 0x2f3   : > { %v1518_v17 = vadd.f32 %v2872_v47, %v1479_v55  ;;  %v1480_v24 = vmul.f32 %v2865_v42, %v1441_v2  ;;  %v1074_v50 = vpop.xlane.xlu0 %1073  ;;  %v1412_v55 = vsub.f32 %v2682_v34, %v2892_v43 }
 0x2f4   : > { %1909 = vrsqrt.f32 %v1348_v39  ;;  %v1349_v35 = vadd.f32 1e-05, %v1317_v40  ;;  %v2918_v5 = vmul.f32 0.0078125, %v1074_v50  ;;  %v1286_v46 = vmul.f32 %v2910_v31, %v2910_v31 }
 0x2f5   : > { %1550 = vst [vmem:[%s2885_s21 + $0x18] sm:$0xff] %v1518_v17  ;;  %v1519_v57 = vadd.f32 %v2872_v47, %v1480_v24  ;;  %v1200_v6 = vpop.xlane.xlu1 %1199  ;;  %v1413_v24 = vsub.f32 %v2686_v28, %v2900_v32 }
 0x2f6   : > { %v1906_v52 = vpop.eup %1905  ;;  %1911 = vrsqrt.f32 %v1349_v35  ;;  %v1254_v12 = vmul.f32 0.0078125, %v1200_v6  ;;  %v1287_v22 = vmul.f32 %v2918_v5, %v2918_v5 }
 0x2f7   : > { %1551 = vst [vmem:[%s2885_s21 + $0x20] sm:$0xff] %v1519_v57  ;;  %v1442_v59 = vmul.f32 %v1906_v52, %v1410_v15  ;;  %v1202_v14 = vpop.xlane.xlu0 %1201 }
 0x2f8   : > { %v1908_v9 = vpop.eup %1907  ;;  %v1318_v8 = vsub.f32 %v1254_v12, %v1286_v46  ;;  %v1255_v11 = vmul.f32 0.0078125, %v1202_v14 }
 0x2f9   : > { %v1481_v33 = vmul.f32 %v2865_v42, %v1442_v59  ;;  %v1443_v1 = vmul.f32 %v1908_v9, %v1411_v45  ;;  %v1076_v61 = vpop.xlane.xlu1 %1075 }
 0x2fa   : > { %v1350_v16 = vadd.f32 1e-05, %v1318_v8  ;;  %v1319_v21 = vsub.f32 %v1255_v11, %v1287_v22  ;;  %v2928_v48 = vmul.f32 0.0078125, %v1076_v61  ;;  %v1414_v8 = vsub.f32 %v2696_v62, %v2910_v31 }
 0x2fb   : > { %v1520_v20 = vadd.f32 %v2872_v47, %v1481_v33  ;;  %v1482_v0 = vmul.f32 %v2865_v42, %v1443_v1  ;;  %v1078_v10 = vpop.xlane.xlu0 %1077 }
 0x2fc   : > { %1913 = vrsqrt.f32 %v1350_v16  ;;  %v1351_v26 = vadd.f32 1e-05, %v1319_v21  ;;  %v2936_v2 = vmul.f32 0.0078125, %v1078_v10  ;;  %v1288_v40 = vmul.f32 %v2928_v48, %v2928_v48 }
 0x2fd   : > { %1552 = vst [vmem:[%s2885_s21 + $0x28] sm:$0xff] %v1520_v20  ;;  %v1521_v23 = vadd.f32 %v2872_v47, %v1482_v0  ;;  %v1204_v29 = vpop.xlane.xlu1 %1203  ;;  %v1415_v21 = vsub.f32 %v2700_v36, %v2918_v5 }
 0x2fe   : > { %v1910_v39 = vpop.eup %1909  ;;  %1915 = vrsqrt.f32 %v1351_v26  ;;  %v1256_v17 = vmul.f32 0.0078125, %v1204_v29  ;;  %v1289_v34 = vmul.f32 %v2936_v2, %v2936_v2 }
 0x2ff   : > { %1553 = vst [vmem:[%s2885_s21 + $0x30] sm:$0xff] %v1521_v23  ;;  %v1444_v50 = vmul.f32 %v1910_v39, %v1412_v55  ;;  %v1206_v35 = vpop.xlane.xlu0 %1205 }
 0x300   : > { %v1912_v57 = vpop.eup %1911  ;;  %v1320_v43 = vsub.f32 %v1256_v17, %v1288_v40  ;;  %v1257_v15 = vmul.f32 0.0078125, %v1206_v35 }
 0x301   : > { %v1483_v6 = vmul.f32 %v2865_v42, %v1444_v50  ;;  %v1445_v52 = vmul.f32 %v1912_v57, %v1413_v24  ;;  %v1080_v46 = vpop.xlane.xlu1 %1079  ;;  %v1416_v57 = vsub.f32 %v2710_v13, %v2928_v48 }
 0x302   : > { %v1352_v12 = vadd.f32 1e-05, %v1320_v43  ;;  %v1321_v45 = vsub.f32 %v1257_v15, %v1289_v34  ;;  %v2946_v59 = vmul.f32 0.0078125, %v1080_v46  ;;  %v1417_v46 = vsub.f32 %v2714_v44, %v2936_v2 }
 0x303   : > { %v1522_v28 = vadd.f32 %v2872_v47, %v1483_v6  ;;  %v1484_v32 = vmul.f32 %v2865_v42, %v1445_v52  ;;  %v1082_v14 = vpop.xlane.xlu0 %1081 }
 0x304   : > { %1917 = vrsqrt.f32 %v1352_v12  ;;  %v1353_v9 = vadd.f32 1e-05, %v1321_v45  ;;  %v2954_v11 = vmul.f32 0.0078125, %v1082_v14  ;;  %v1290_v61 = vmul.f32 %v2946_v59, %v2946_v59 }
 0x305   : > { %1554 = vst [vmem:[%s2885_s21 + $0x38] sm:$0xff] %v1522_v28  ;;  %v1523_v22 = vadd.f32 %v2872_v47, %v1484_v32  ;;  %v1208_v33 = vpop.xlane.xlu1 %1207 }
 0x306   : > { %v1914_v1 = vpop.eup %1913  ;;  %1919 = vrsqrt.f32 %v1353_v9  ;;  %v1258_v16 = vmul.f32 0.0078125, %v1208_v33  ;;  %v1291_v62 = vmul.f32 %v2954_v11, %v2954_v11 }
 0x307   : > { %1555 = vst [vmem:[%s2885_s21 + $0x40] sm:$0xff] %v1523_v22  ;;  %v1446_v20 = vmul.f32 %v1914_v1, %v1414_v8  ;;  %v1210_v0 = vpop.xlane.xlu0 %1209 }
 0x308   : > { %v1916_v10 = vpop.eup %1915  ;;  %v1322_v31 = vsub.f32 %v1258_v16, %v1290_v61  ;;  %v1259_v26 = vmul.f32 0.0078125, %v1210_v0 }
 0x309   : > { %v1485_v23 = vmul.f32 %v2865_v42, %v1446_v20  ;;  %v1447_v55 = vmul.f32 %v1916_v10, %v1415_v21  ;;  %v1084_v29 = vpop.xlane.xlu1 %1083  ;;  %v1418_v20 = vsub.f32 %v2724_v25, %v2946_v59 }
 0x30a   : > { %v1354_v39 = vadd.f32 1e-05, %v1322_v31  ;;  %v1323_v40 = vsub.f32 %v1259_v26, %v1291_v62  ;;  %v2964_v17 = vmul.f32 0.0078125, %v1084_v29 }
 0x30b   : > { %v1524_v36 = vadd.f32 %v2872_v47, %v1485_v23  ;;  %v1486_v5 = vmul.f32 %v2865_v42, %v1447_v55  ;;  %v1086_v24 = vpop.xlane.xlu0 %1085  ;;  %v1419_v23 = vsub.f32 %v2728_v49, %v2954_v11 }
 0x30c   : > { %1921 = vrsqrt.f32 %v1354_v39  ;;  %v1355_v50 = vadd.f32 1e-05, %v1323_v40  ;;  %v2972_v34 = vmul.f32 0.0078125, %v1086_v24  ;;  %v1292_v6 = vmul.f32 %v2964_v17, %v2964_v17 }
 0x30d   : > { %1556 = vst [vmem:[%s2885_s21 + $0x48] sm:$0xff] %v1524_v36  ;;  %v1525_v35 = vadd.f32 %v2872_v47, %v1486_v5  ;;  %v1212_v43 = vpop.xlane.xlu1 %1211 }
 0x30e   : > { %v1918_v15 = vpop.eup %1917  ;;  %1923 = vrsqrt.f32 %v1355_v50  ;;  %v1260_v52 = vmul.f32 0.0078125, %v1212_v43  ;;  %v1293_v13 = vmul.f32 %v2972_v34, %v2972_v34 }
 0x30f   : > { %1557 = vst [vmem:[%s2885_s21 + $0x50] sm:$0xff] %v1525_v35  ;;  %v1448_v12 = vmul.f32 %v1918_v15, %v1416_v57  ;;  %v1214_v45 = vpop.xlane.xlu0 %1213 }
 0x310   : > { %v1920_v28 = vpop.eup %1919  ;;  %v1324_v48 = vsub.f32 %v1260_v52, %v1292_v6  ;;  %v1261_v32 = vmul.f32 0.0078125, %v1214_v45  ;;  %v1420_v52 = vsub.f32 %v2738_v37, %v2964_v17 }
 0x311   : > { %v1487_v14 = vmul.f32 %v2865_v42, %v1448_v12  ;;  %v1449_v9 = vmul.f32 %v1920_v28, %v1417_v46  ;;  %v1088_v22 = vpop.xlane.xlu1 %1087 }
 0x312   : > { %v1356_v8 = vadd.f32 1e-05, %v1324_v48  ;;  %v1325_v33 = vsub.f32 %v1261_v32, %v1293_v13  ;;  %v2982_v1 = vmul.f32 0.0078125, %v1088_v22  ;;  %v1421_v48 = vsub.f32 %v2742_v51, %v2972_v34 }
 0x313   : > { %v1526_v44 = vadd.f32 %v2872_v47, %v1487_v14  ;;  %v1488_v2 = vmul.f32 %v2865_v42, %v1449_v9  ;;  %v1090_v61 = vpop.xlane.xlu0 %1089 }
 0x314   : > { %1925 = vrsqrt.f32 %v1356_v8  ;;  %v1357_v16 = vadd.f32 1e-05, %v1325_v33  ;;  %v2990_v0 = vmul.f32 0.0078125, %v1090_v61  ;;  %v1294_v31 = vmul.f32 %v2982_v1, %v2982_v1 }
 0x315   : > { %1558 = vst [vmem:[%s2885_s21 + $0x58] sm:$0xff] %v1526_v44  ;;  %v1527_v21 = vadd.f32 %v2872_v47, %v1488_v2  ;;  %v1216_v10 = vpop.xlane.xlu1 %1215 }
 0x316   : > { %v1922_v62 = vpop.eup %1921  ;;  %1927 = vrsqrt.f32 %v1357_v16  ;;  %v1262_v26 = vmul.f32 0.0078125, %v1216_v10  ;;  %v1295_v25 = vmul.f32 %v2990_v0, %v2990_v0 }
 0x317   : > { %1559 = vst [vmem:[%s2885_s21 + $0x60] sm:$0xff] %v1527_v21  ;;  %v1450_v55 = vmul.f32 %v1922_v62, %v1418_v20  ;;  %v1218_v29 = vpop.xlane.xlu0 %1217  ;;  %v1422_v62 = vsub.f32 %v2752_v4, %v2982_v1 }
 0x318   : > { %v1924_v39 = vpop.eup %1923  ;;  %v1326_v59 = vsub.f32 %v1262_v26, %v1294_v31  ;;  %v1263_v40 = vmul.f32 0.0078125, %v1218_v29 }
 0x319   : > { %v1489_v36 = vmul.f32 %v2865_v42, %v1450_v55  ;;  %v1451_v5 = vmul.f32 %v1924_v39, %v1419_v23  ;;  %v1092_v24 = vpop.xlane.xlu1 %1091  ;;  %v1423_v39 = vsub.f32 %v2756_v53, %v2990_v0 }
 0x31a   : > { %v1358_v50 = vadd.f32 1e-05, %v1326_v59  ;;  %v1327_v35 = vsub.f32 %v1263_v40, %v1295_v25  ;;  %v3000_v57 = vmul.f32 0.0078125, %v1092_v24 }
 0x31b   : > { %v1528_v49 = vadd.f32 %v2872_v47, %v1489_v36  ;;  %v1490_v11 = vmul.f32 %v2865_v42, %v1451_v5  ;;  %v1094_v43 = vpop.xlane.xlu0 %1093 }
 0x31c   : > { %1929 = vrsqrt.f32 %v1358_v50  ;;  %v1359_v15 = vadd.f32 1e-05, %v1327_v35  ;;  %v3008_v46 = vmul.f32 0.0078125, %v1094_v43  ;;  %v1296_v28 = vmul.f32 %v3000_v57, %v3000_v57 }
 0x31d   : > { %1560 = vst [vmem:[%s2885_s21 + $0x68] sm:$0xff] %v1528_v49  ;;  %v1529_v6 = vadd.f32 %v2872_v47, %v1490_v11  ;;  %v1220_v12 = vpop.xlane.xlu1 %1219 }
 0x31e   : > { %v1926_v45 = vpop.eup %1925  ;;  %1931 = vrsqrt.f32 %v1359_v15  ;;  %v1264_v13 = vmul.f32 0.0078125, %v1220_v12  ;;  %v1297_v37 = vmul.f32 %v3008_v46, %v3008_v46 }
 0x31f   : > { %1561 = vst [vmem:[%s2885_s21 + $0x70] sm:$0xff] %v1529_v6  ;;  %v1452_v32 = vmul.f32 %v1926_v45, %v1420_v52  ;;  %v1222_v14 = vpop.xlane.xlu0 %1221  ;;  %v1424_v52 = vsub.f32 %v2766_v18, %v3000_v57 }
 0x320   : > { %v1928_v9 = vpop.eup %1927  ;;  %v1328_v17 = vsub.f32 %v1264_v13, %v1296_v28  ;;  %v1265_v22 = vmul.f32 0.0078125, %v1222_v14 }
 0x321   : > { %v1491_v8 = vmul.f32 %v2865_v42, %v1452_v32  ;;  %v1453_v33 = vmul.f32 %v1928_v9, %v1421_v48  ;;  %v1096_v44 = vpop.xlane.xlu1 %1095  ;;  %v1425_v32 = vsub.f32 %v2770_v54, %v3008_v46 }
 0x322   : > { %v1360_v2 = vadd.f32 1e-05, %v1328_v17  ;;  %v1329_v61 = vsub.f32 %v1265_v22, %v1297_v37  ;;  %v3018_v16 = vmul.f32 0.0078125, %v1096_v44 }
 0x323   : > { %v1530_v51 = vadd.f32 %v2872_v47, %v1491_v8  ;;  %v1492_v34 = vmul.f32 %v2865_v42, %v1453_v33  ;;  %v1098_v21 = vpop.xlane.xlu0 %1097 }
 0x324   : > { %1933 = vrsqrt.f32 %v1360_v2  ;;  %v1361_v20 = vadd.f32 1e-05, %v1329_v61  ;;  %v3026_v31 = vmul.f32 0.0078125, %v1098_v21  ;;  %v1298_v55 = vmul.f32 %v3018_v16, %v3018_v16 }
 0x325   : > { %1562 = vst [vmem:[%s2885_s21 + $0x78] sm:$0xff] %v1530_v51  ;;  %v1531_v10 = vadd.f32 %v2872_v47, %v1492_v34  ;;  %v1224_v26 = vpop.xlane.xlu1 %1223 }
 0x326   : > { %v1930_v23 = vpop.eup %1929  ;;  %1935 = vrsqrt.f32 %v1361_v20  ;;  %v1266_v29 = vmul.f32 0.0078125, %v1224_v26  ;;  %v1299_v4 = vmul.f32 %v3026_v31, %v3026_v31  ;;  %v1426_v20 = vsub.f32 %v2780_v27, %v3018_v16 }
 0x327   : > { %1563 = vst [vmem:[%s2885_s21 + $0x80] sm:$0xff] %v1531_v10  ;;  %v1454_v25 = vmul.f32 %v1930_v23, %v1422_v62  ;;  %v1226_v59 = vpop.xlane.xlu0 %1225 }
 0x328   : > { %v1932_v40 = vpop.eup %1931  ;;  %v1330_v1 = vsub.f32 %v1266_v29, %v1298_v55  ;;  %v1267_v36 = vmul.f32 0.0078125, %v1226_v59  ;;  %v1427_v29 = vsub.f32 %v2784_v56, %v3026_v31 }
 0x329   : > { %v1493_v5 = vmul.f32 %v2865_v42, %v1454_v25  ;;  %v1455_v24 = vmul.f32 %v1932_v40, %v1423_v39  ;;  %v1100_v50 = vpop.xlane.xlu1 %1099 }
 0x32a   : > { %v1362_v35 = vadd.f32 1e-05, %v1330_v1  ;;  %v1331_v49 = vsub.f32 %v1267_v36, %v1299_v4  ;;  %v3036_v11 = vmul.f32 0.0078125, %v1100_v50 }
 0x32b   : > { %v1532_v53 = vadd.f32 %v2872_v47, %v1493_v5  ;;  %v1494_v0 = vmul.f32 %v2865_v42, %v1455_v24  ;;  %v1102_v43 = vpop.xlane.xlu0 %1101 }
 0x32c   : > { %1937 = vrsqrt.f32 %v1362_v35  ;;  %v1363_v15 = vadd.f32 1e-05, %v1331_v49  ;;  %v3044_v12 = vmul.f32 0.0078125, %v1102_v43  ;;  %v1300_v13 = vmul.f32 %v3036_v11, %v3036_v11 }
 0x32d   : > { %1564 = vst [vmem:[%s2885_s21 + $0x88] sm:$0xff] %v1532_v53  ;;  %v1533_v6 = vadd.f32 %v2872_v47, %v1494_v0  ;;  %v1228_v45 = vpop.xlane.xlu1 %1227  ;;  %v1428_v0 = vsub.f32 %v2794_v38, %v3036_v11 }
 0x32e   : > { %v1934_v28 = vpop.eup %1933  ;;  %1939 = vrsqrt.f32 %v1363_v15  ;;  %v1268_v48 = vmul.f32 0.0078125, %v1228_v45  ;;  %v1301_v18 = vmul.f32 %v3044_v12, %v3044_v12 }
 0x32f   : > { %1565 = vst [vmem:[%s2885_s21 + $0x90] sm:$0xff] %v1533_v6  ;;  %v1456_v14 = vmul.f32 %v1934_v28, %v1424_v52  ;;  %v1230_v9 = vpop.xlane.xlu0 %1229  ;;  %v1429_v28 = vsub.f32 %v2798_v58, %v3044_v12 }
 0x330   : > { %v1936_v37 = vpop.eup %1935  ;;  %v1332_v57 = vsub.f32 %v1268_v48, %v1300_v13  ;;  %v1269_v17 = vmul.f32 0.0078125, %v1230_v9 }
 0x331   : > { %v1495_v22 = vmul.f32 %v2865_v42, %v1456_v14  ;;  %v1457_v8 = vmul.f32 %v1936_v37, %v1425_v32  ;;  %v1104_v33 = vpop.xlane.xlu1 %1103 }
 0x332   : > { %v1364_v44 = vadd.f32 1e-05, %v1332_v57  ;;  %v1333_v2 = vsub.f32 %v1269_v17, %v1301_v18  ;;  %v3054_v61 = vmul.f32 0.0078125, %v1104_v33 }
 0x333   : > { %v1534_v54 = vadd.f32 %v2872_v47, %v1495_v22  ;;  %v1496_v46 = vmul.f32 %v2865_v42, %v1457_v8  ;;  %v1106_v51 = vpop.xlane.xlu0 %1105 }
 0x334   : > { %1941 = vrsqrt.f32 %v1364_v44  ;;  %v1365_v34 = vadd.f32 1e-05, %v1333_v2  ;;  %v3062_v10 = vmul.f32 0.0078125, %v1106_v51  ;;  %v1302_v23 = vmul.f32 %v3054_v61, %v3054_v61 }
 0x335   : > { %1566 = vst [vmem:[%s2885_s21 + $0x98] sm:$0xff] %v1534_v54  ;;  %v1535_v21 = vadd.f32 %v2872_v47, %v1496_v46  ;;  %v1232_v62 = vpop.xlane.xlu1 %1231  ;;  %v1430_v2 = vsub.f32 %v2808_v7, %v3054_v61 }
 0x336   : > { %v1938_v26 = vpop.eup %1937  ;;  %1943 = vrsqrt.f32 %v1365_v34  ;;  %v1270_v55 = vmul.f32 0.0078125, %v1232_v62  ;;  %v1303_v27 = vmul.f32 %v3062_v10, %v3062_v10 }
 0x337   : > { %1567 = vst [vmem:[%s2885_s21 + $0xa0] sm:$0xff] %v1535_v21  ;;  %v1458_v39 = vmul.f32 %v1938_v26, %v1426_v20  ;;  %v1234_v25 = vpop.xlane.xlu0 %1233  ;;  %v1431_v20 = vsub.f32 %v2812_v60, %v3062_v10 }
 0x338   : > { %v1940_v59 = vpop.eup %1939  ;;  %v1334_v16 = vsub.f32 %v1270_v55, %v1302_v23  ;;  %v1271_v40 = vmul.f32 0.0078125, %v1234_v25 }
 0x339   : > { %v1497_v4 = vmul.f32 %v2865_v42, %v1458_v39  ;;  %v1459_v1 = vmul.f32 %v1940_v59, %v1427_v29  ;;  %v1108_v36 = vpop.xlane.xlu1 %1107 }
 0x33a   : > { %v1366_v5 = vadd.f32 1e-05, %v1334_v16  ;;  %v1335_v24 = vsub.f32 %v1271_v40, %v1303_v27  ;;  %v3072_v50 = vmul.f32 0.0078125, %v1108_v36 }
 0x33b   : > { %v1536_v56 = vadd.f32 %v2872_v47, %v1497_v4  ;;  %v1498_v31 = vmul.f32 %v2865_v42, %v1459_v1  ;;  %v1110_v35 = vpop.xlane.xlu0 %1109 }
 0x33c   : > { %1945 = vrsqrt.f32 %v1366_v5  ;;  %v1367_v49 = vadd.f32 1e-05, %v1335_v24  ;;  %v3080_v43 = vmul.f32 0.0078125, %v1110_v35  ;;  %v1304_v52 = vmul.f32 %v3072_v50, %v3072_v50 }
 0x33d   : > { %1568 = vst [vmem:[%s2885_s21 + $0xa8] sm:$0xff] %v1536_v56  ;;  %v1537_v53 = vadd.f32 %v2872_v47, %v1498_v31  ;;  %v1236_v15 = vpop.xlane.xlu1 %1235  ;;  %v1432_v1 = vsub.f32 %v2822_v19, %v3072_v50 }
 0x33e   : > { %v1942_v6 = vpop.eup %1941  ;;  %1947 = vrsqrt.f32 %v1367_v49  ;;  %v1272_v45 = vmul.f32 0.0078125, %v1236_v15  ;;  %v1305_v38 = vmul.f32 %v3080_v43, %v3080_v43  ;;  %v1433_v31 = vsub.f32 %v2826_v63, %v3080_v43 }
 0x33f   : > { %1569 = vst [vmem:[%s2885_s21 + $0xb0] sm:$0xff] %v1537_v53  ;;  %v1460_v13 = vmul.f32 %v1942_v6, %v1428_v0  ;;  %v1238_v48 = vpop.xlane.xlu0 %1237 }
 0x340   : > { %v1944_v32 = vpop.eup %1943  ;;  %v1336_v11 = vsub.f32 %v1272_v45, %v1304_v52  ;;  %v1273_v14 = vmul.f32 0.0078125, %v1238_v48 }
 0x341   : > { %v1499_v9 = vmul.f32 %v2865_v42, %v1460_v13  ;;  %v1461_v37 = vmul.f32 %v1944_v32, %v1429_v28  ;;  %v1112_v18 = vpop.xlane.xlu1 %1111 }
 0x342   : > { %v1368_v57 = vadd.f32 1e-05, %v1336_v11  ;;  %v1337_v17 = vsub.f32 %v1273_v14, %v1305_v38  ;;  %v1146_v22 = vmul.f32 0.0078125, %v1112_v18 }
 0x343   : > { %v1538_v8 = vadd.f32 %v2872_v47, %v1499_v9  ;;  %v1500_v58 = vmul.f32 %v2865_v42, %v1461_v37  ;;  %v1114_v12 = vpop.xlane.xlu0 %1113 }
 0x344   : > { %1949 = vrsqrt.f32 %v1368_v57  ;;  %v1369_v33 = vadd.f32 1e-05, %v1337_v17  ;;  %v1147_v54 = vmul.f32 0.0078125, %v1114_v12  ;;  %v1306_v34 = vmul.f32 %v1146_v22, %v1146_v22 }
 0x345   : > { %1570 = vst [vmem:[%s2885_s21 + $0xb8] sm:$0xff] %v1538_v8  ;;  %v1539_v44 = vadd.f32 %v2872_v47, %v1500_v58  ;;  %v1240_v46 = vpop.xlane.xlu1 %1239  ;;  %v1434_v45 = vsub.f32 %v2836_v30, %v1146_v22 }
 0x346   : > { %v1946_v51 = vpop.eup %1945  ;;  %1951 = vrsqrt.f32 %v1369_v33  ;;  %v1274_v21 = vmul.f32 0.0078125, %v1240_v46  ;;  %v1307_v55 = vmul.f32 %v1147_v54, %v1147_v54  ;;  %v1435_v43 = vsub.f32 %v2840_v3, %v1147_v54 }
 0x347   : > { %1571 = vst [vmem:[%s2885_s21 + $0xc0] sm:$0xff] %v1539_v44  ;;  %v1462_v62 = vmul.f32 %v1946_v51, %v1430_v2  ;;  %v1242_v26 = vpop.xlane.xlu0 %1241 }
 0x348   : > { %v1948_v23 = vpop.eup %1947  ;;  %v1338_v29 = vsub.f32 %v1274_v21, %v1306_v34  ;;  %v1275_v39 = vmul.f32 0.0078125, %v1242_v26 }
 0x349   : > { %v1501_v25 = vmul.f32 %v2865_v42, %v1462_v62  ;;  %v1463_v7 = vmul.f32 %v1948_v23, %v1431_v20  ;;  %v1116_v61 = vpop.xlane.xlu1 %1115 }
 0x34a   : > { %v1370_v59 = vadd.f32 1e-05, %v1338_v29  ;;  %v1339_v27 = vsub.f32 %v1275_v39, %v1307_v55  ;;  %v1148_v16 = vmul.f32 0.0078125, %v1116_v61 }
 0x34b   : > { %v1540_v40 = vadd.f32 %v2872_v47, %v1501_v25  ;;  %v1502_v4 = vmul.f32 %v2865_v42, %v1463_v7 }
 0x34c   : > { %1953 = vrsqrt.f32 %v1370_v59  ;;  %v1371_v60 = vadd.f32 1e-05, %v1339_v27  ;;  %v1308_v24 = vmul.f32 %v1148_v16, %v1148_v16  ;;  %v1436_v14 = vsub.f32 %v2850_v41, %v1148_v16 }
 0x34d   : > { %1572 = vst [vmem:[%s2885_s21 + $0xc8] sm:$0xff] %v1540_v40  ;;  %v1541_v10 = vadd.f32 %v2872_v47, %v1502_v4  ;;  %v1244_v36 = vpop.xlane.xlu1 %1243 }
 0x34e   : > { %v1950_v5 = vpop.eup %1949  ;;  %1955 = vrsqrt.f32 %v1371_v60  ;;  %v1276_v56 = vmul.f32 0.0078125, %v1244_v36 }
 0x34f   : > { %1573 = vst [vmem:[%s2885_s21 + $0xd0] sm:$0xff] %v1541_v10  ;;  %v1464_v35 = vmul.f32 %v1950_v5, %v1432_v1 }
 0x350   : > { %v1952_v49 = vpop.eup %1951  ;;  %v1340_v53 = vsub.f32 %v1276_v56, %v1308_v24 }
 0x351   : > { %v1503_v0 = vmul.f32 %v2865_v42, %v1464_v35  ;;  %v1465_v15 = vmul.f32 %v1952_v49, %v1433_v31 }
 0x352   : > { %v1372_v6 = vadd.f32 1e-05, %v1340_v53 }
 0x353   : > { %v1542_v19 = vadd.f32 %v2872_v47, %v1503_v0  ;;  %v1504_v50 = vmul.f32 %v2865_v42, %v1465_v15 }
 0x354   : > { %1957 = vrsqrt.f32 %v1372_v6 }
 0x355   : > { %1574 = vst [vmem:[%s2885_s21 + $0xd8] sm:$0xff] %v1542_v19  ;;  %v1543_v52 = vadd.f32 %v2872_v47, %v1504_v50 }
 0x356   : > { %v1954_v63 = vpop.eup %1953 }
 0x357   : > { %1575 = vst [vmem:[%s2885_s21 + $0xe0] sm:$0xff] %v1543_v52  ;;  %v1466_v28 = vmul.f32 %v1954_v63, %v1434_v45 }
 0x358   : > { %v1956_v13 = vpop.eup %1955 }
 0x359   : > { %v1505_v48 = vmul.f32 %v2865_v42, %v1466_v28  ;;  %v1467_v32 = vmul.f32 %v1956_v13, %v1435_v43 }
 0x35b   : > { %v1544_v38 = vadd.f32 %v2872_v47, %v1505_v48  ;;  %v1506_v11 = vmul.f32 %v2865_v42, %v1467_v32 }
 0x35d   : > { %1576 = vst [vmem:[%s2885_s21 + $0xe8] sm:$0xff] %v1544_v38  ;;  %v1545_v30 = vadd.f32 %v2872_v47, %v1506_v11 }
 0x35e   : > { %v1958_v9 = vpop.eup %1957 }
 0x35f   : > { %1577 = vst [vmem:[%s2885_s21 + $0xf0] sm:$0xff] %v1545_v30  ;;  %v1468_v3 = vmul.f32 %v1958_v9, %v1436_v14 }
 0x361   : > { %v1507_v37 = vmul.f32 %v2865_v42, %v1468_v3 }
 0x363   : > { %v1546_v18 = vadd.f32 %v2872_v47, %v1507_v37 }
 0x365   : > { %1578 = vst [vmem:[%s2885_s21 + $0xf8] sm:$0xff] %v1546_v18 }
 0x366   : > { %2058 = shalt.err (!%p2055_p2)
}
 0x367   : > { %s2059_s16 = scalar_lea.hbm %s3130_s30, 4096  ;;  %s2063_s21 = scalar_lea.hbm %s3185_s7, 8192 }
 0x368   : > { %p2060_p13 = scmp.ne.s32.totalorder %s3130_s30, %s2059_s16  ;;  %p2064_p4 = scmp.lt.u32.totalorder %s3130_s30, %s3185_s7 }
 0x369   : > { %p2065_p7 = scmp.lt.u32.totalorder %s2063_s21, %s2059_s16  ;;  %p2067_p11 = scmp.lt.u32.totalorder %s2059_s16, %s3130_s30 }
 0x36a   : > { %p2061_p6 = pnand %p2060_p13, %p3201_p0 }
 0x36b   : > { %p2066_p8 = por %p2065_p7, %p2064_p4 }
 0x36c   : > { %p2062_p10 = pneg %p2061_p6 }
 0x36d   : > { %p2068_p1 = por %p2067_p11, %p2066_p8 }
 0x36f   : > { %p2069_p3 = pnand %p2068_p1, %p2062_p10 }
 0x371   : > { %2072 = shalt.err (!%p2069_p3)
}
 0x372   : > { %s2127_s15 = smov 128   ;;  %s2128_s23 = smov 8  }
 0x373   : > { %1830 = dma.vmem_to_hbm [thread:$0]  (%p3201_p0), %s3132_s29, 4096, %s3130_s30, %s1580_s9, %s2127_s15, %s2127_s15, %s2128_s23  }
 0x374 PF: > { %s1608_s28 = sand.u32 1, %s2103_s24   ;;  %p3202_p5 = scmp.ne.s32.totalorder %s3191_s8, 0 }
 0x375   : > { %p3203_p9 = scmp.ge.s32.totalorder %s2115_s27, 2  ;;  %s1609_s11 = scalar_lea.sflag [#allocation4], %s1608_s28 }
 0x377   : > { %p1844_p12 = pnand %p3203_p9, %p3202_p5 }
 0x379   : > { %2098 = dma.done.wait (!%p1844_p12), %s1609_s11, 4096  }
 0x37a   : > { %2100 = vsyncadd (!%p1844_p12), %s1609_s11, 4294963200  ;;  %p21_p2 = scmp.ge.s32.totalorder %s2282_s13, 4   ;;  %s3204_s24 = smov %s2107_s25 }
 0x37b   : > { %s3205_s25 = smov %s2111_s26  ;;  %s3206_s26 = smov %s2291_s17 }
 0x37c   : > { %s3207_s27 = smov %s2282_s13  ;;  %23 = sbr.rel (!%p21_p2) target bundleno = 6 (0x6), region = 101 }
 0x383   :  { %1614 = vsyncpa [#allocation3], 1 }
 0x384   :  { %1616 = vsyncpa [#allocation3 + $0x1], 1 }
 0x385   :  { %1617 = vsyncpa [#allocation6], 1 }
 0x386   :  { %1618 = vsyncpa [#allocation4], 1 }
 0x387   :  { %1620 = vsyncpa [#allocation4 + $0x1], 1 }

</bundles_post_ra>
